<compile_context>
chip_gen: v5e
topology: v5e:2x2
jax: 0.10.0
libtpu: 0.0.40
codegen_flags: <defaults>
</compile_context>

<pallas_src>
import functools

import numpy as np
import jax
import jax.numpy as jnp
from jax import lax
from jax.experimental import pallas as pl
from jax.experimental.pallas import tpu as pltpu

EPS = 1.001e-05
LANE = 128
SUBLANE = 8


def _round_up(x, m):
    return (x + m - 1) // m * m


def _pad_to(a, shape):
    pads = [(0, t - s) for s, t in zip(a.shape, shape)]
    return jnp.pad(a, pads)


# ------------------------------ Pallas kernel --------------------------------

def _bottleneck_kernel(x_ref, xh_ref, w1_ref, b1_ref, w2_ref, b2_ref,
                       w3_ref, b3_ref, o_ref, h1p_ref, *, W, pad_rows):
    # x_ref : (TH, Wp, Cinp)    act dtype  (one row tile, NHWC, lane-padded)
    # xh_ref: (2, Wp, Cinp)     act dtype  (row above / below this tile)
    # w1_ref: (Cinp, Cwp)       bf16       (BN1 scale folded in)
    # b1_ref: (1, Cwp)          f32
    # w2_ref: (3, 3, Cwp, Cwp)  bf16       (per (kh,kw) tap, BN2 folded)
    # b2_ref: (1, Cwp)          f32
    # w3_ref: (Cwp, Coutp)      bf16       (BN3 scale folded in)
    # b3_ref: (1, Coutp)        f32
    # o_ref : (TH, Wp, Coutp)   act dtype
    # h1p_ref: (TH+2, Wp, Cwp)  bf16 VMEM scratch (h1 rows + 1-row conv halo)
    TH, Wp, Coutp = o_ref.shape
    Cinp = x_ref.shape[-1]
    Cwp = w1_ref.shape[-1]
    f32, bf16 = jnp.float32, jnp.bfloat16
    M = TH * Wp

    # ---- stage 1: 1x1 conv (BN1 folded) + bias + relu, bf16 on the MXU ------
    x1 = x_ref[...].reshape(M, Cinp).astype(bf16)
    h1 = jnp.maximum(
        jnp.dot(x1, w1_ref[...], preferred_element_type=f32) + b1_ref[...], 0.0)
    h1 = h1.astype(bf16).reshape(TH, Wp, Cwp)          # cast once, before staging

    # recompute h1 for the two halo rows (the neighbour tiles' edge rows).
    xh = xh_ref[...].reshape(2 * Wp, Cinp).astype(bf16)
    h1h = jnp.maximum(
        jnp.dot(xh, w1_ref[...], preferred_element_type=f32) + b1_ref[...], 0.0)
    h1h = h1h.astype(bf16).reshape(2, Wp, Cwp)

    if W < Wp:
        # Zero h1 on the spatial-padding columns: their 1x1-conv bias would
        # otherwise leak into the last valid column through the 3x3 conv.
        col = lax.broadcasted_iota(jnp.int32, (1, Wp, 1), 1)
        h1 = jnp.where(col < W, h1, jnp.zeros_like(h1))
        h1h = jnp.where(col < W, h1h, jnp.zeros_like(h1h))

    # ---- stage h1 into the bf16 row-halo scratch (full-width, aligned) ------
    h1p_ref[1:TH + 1, :, :] = h1
    h1p_ref[0:1, :, :] = h1h[0:1]
    h1p_ref[TH + 1:TH + 2, :, :] = h1h[1:2]

    i = pl.program_id(1)

    @pl.when(i == 0)                           # top image boundary -> conv padding
    def _():
        h1p_ref[0:1, :, :] = jnp.zeros((1, Wp, Cwp), bf16)

    @pl.when(i == pl.num_programs(1) - 1)      # bottom boundary (+ H-padding rows)
    def _():
        h1p_ref[TH + 1 - pad_rows:TH + 2, :, :] = jnp.zeros(
            (1 + pad_rows, Wp, Cwp), bf16)

    # ---- stage 2: 3x3 conv (pad=1) as 9 accumulating K=Cwp matmuls ----------
    # (no im2col concat temp; left/right taps are bf16 shifted copies.
    #  TODO(synk): on v6e/v7x a single wide-K (M, 3*Cwp or 9*Cwp) bf16 patch
    #  matmul feeds the 2x256^2 MXU better once VMEM allows.)
    zcol = jnp.zeros((TH, 1, Cwp), bf16)
    acc = jnp.zeros((M, Cwp), f32)
    for kh in range(3):
        rows = h1p_ref[kh:kh + TH, :, :]                             # (TH, Wp, Cwp)
        left = jnp.concatenate([zcol, rows[:, :Wp - 1, :]], axis=1)  # in[x-1]
        right = jnp.concatenate([rows[:, 1:, :], zcol], axis=1)      # in[x+1]
        for kw, tap in enumerate((left, rows, right)):
            acc = acc + jnp.dot(tap.reshape(M, Cwp), w2_ref[kh, kw],
                                preferred_element_type=f32)
    h2 = jnp.maximum(acc + b2_ref[...], 0.0).astype(bf16)

    # ---- stage 3: 1x1 conv (BN3 folded) + bias + residual + relu ------------
    y = jnp.dot(h2, w3_ref[...], preferred_element_type=f32) + b3_ref[...]
    # re-read x for the identity path (narrow live range; Cinp == Coutp).
    y = y + x_ref[...].reshape(M, Coutp).astype(f32)
    o_ref[...] = jnp.maximum(y, 0.0).reshape(TH, Wp, Coutp).astype(o_ref.dtype)


# ------------------------------- parameters ----------------------------------

def fold_bn(gamma, beta, mean, var):
    scale = gamma / jnp.sqrt(var + EPS)
    bias = beta - mean * scale
    return scale.astype(jnp.float32), bias.astype(jnp.float32)


def init_params(key, inplanes, planes, base_width=64, groups=1):
    width = int(planes * (base_width / 64.0)) * groups
    out_ch = planes * 4  # expansion
    ks = jax.random.split(key, 12)

    def conv_w(k, o, i, kh, kw):
        return (0.1 * jax.random.normal(k, (o, i, kh, kw))).astype(jnp.float32)

    def bn_p(k, c):
        k1, k2, k3, k4 = jax.random.split(k, 4)
        gamma = 1.0 + 0.1 * jax.random.normal(k1, (c,))
        beta = 0.1 * jax.random.normal(k2, (c,))
        mean = 0.1 * jax.random.normal(k3, (c,))
        var = 0.5 + jnp.abs(jax.random.normal(k4, (c,)))
        return (gamma.astype(jnp.float32), beta.astype(jnp.float32),
                mean.astype(jnp.float32), var.astype(jnp.float32))

    return dict(
        w1=conv_w(ks[0], width, inplanes, 1, 1),
        bn1=bn_p(ks[1], width),
        w2=conv_w(ks[2], width, width, 3, 3),
        bn2=bn_p(ks[3], width),
        w3=conv_w(ks[4], out_ch, width, 1, 1),
        bn3=bn_p(ks[5], out_ch),
        width=width, out_ch=out_ch,
    )


def _prep_weights(p, Cinp, Cwp, Coutp):
    """Fold BN scales into conv weights, pad channels to 128 lanes, cast bf16."""
    s1, b1 = fold_bn(*p["bn1"])
    s2, b2 = fold_bn(*p["bn2"])
    s3, b3 = fold_bn(*p["bn3"])

    # conv1 (OIHW 1x1) -> (Cin, Cout), BN1 scale folded on output channels.
    w1 = jnp.transpose(p["w1"][:, :, 0, 0], (1, 0)) * s1[None, :]
    w1 = _pad_to(w1, (Cinp, Cwp)).astype(jnp.bfloat16)

    # conv2 (OIHW 3x3) -> (kh, kw, Cin, Cout), BN2 folded, channel-padded.
    w2 = p["w2"] * s2[:, None, None, None]
    w2 = jnp.transpose(w2, (2, 3, 1, 0))
    w2 = _pad_to(w2, (3, 3, Cwp, Cwp)).astype(jnp.bfloat16)

    # conv3 (OIHW 1x1) -> (Cin, Cout), BN3 folded.
    w3 = jnp.transpose(p["w3"][:, :, 0, 0], (1, 0)) * s3[None, :]
    w3 = _pad_to(w3, (Cwp, Coutp)).astype(jnp.bfloat16)

    b1 = _pad_to(b1, (Cwp,)).reshape(1, Cwp)
    b2 = _pad_to(b2, (Cwp,)).reshape(1, Cwp)
    b3 = _pad_to(b3, (Coutp,)).reshape(1, Coutp)
    return w1, b1, w2, b2, w3, b3


def _vmem_limit_bytes():
    """Per-generation scoped-VMEM budget (perf hint only)."""
    try:
        kind = jax.devices()[0].device_kind.lower()
    except Exception:
        return None
    if "v7" in kind:
        return 48 * 1024 * 1024      # 64 MiB physical per TC: leave headroom
    if "v5" in kind or "v6" in kind:
        return 96 * 1024 * 1024      # 128 MiB physical VMEM
    return None                      # unknown chip: keep compiler default


# ----------------------------- forward (Pallas) -------------------------------

def bottleneck_forward_nhwc(x_nhwc, p, *, row_tile=8):
    """Fused Bottleneck forward on NHWC activations (layout-friendly entry).

    In a real model keep activations NHWC (and ideally bf16) end-to-end and
    call this directly; the NCHW wrapper below exists only for parity with the
    PyTorch module and pays an extra HBM round-trip per transpose.
    """
    N, H, W, Cin = x_nhwc.shape
    Cw, Cout = p["width"], p["out_ch"]
    assert Cin == Cout, "residual path assumes downsample=None (inplanes == planes*4)"
    # TODO(synk): stride>1 / downsample branch not implemented (not exercised
    # when downsample is None, as in the reference forward with defaults).

    Cinp = _round_up(Cin, LANE)
    Cwp = _round_up(Cw, LANE)
    Coutp = _round_up(Cout, LANE)

    TH = min(row_tile, H)                 # rows per grid step
    Hp = _round_up(H, TH)
    Wp = _round_up(W, SUBLANE)            # sublane-aligned width -> free reshapes
    R = Hp // TH
    pad_rows = Hp - H

    w1, b1, w2, b2, w3, b3 = _prep_weights(p, Cinp, Cwp, Coutp)

    # Zero-pad spatial dims to the tile grid and channels to full lanes.
    xpd = jnp.pad(x_nhwc, ((0, 0), (0, Hp - H), (0, Wp - W), (0, Cinp - Cin)))
    # Per-tile halo rows (row above / below each tile; zeros at image borders).
    xrows = jnp.pad(xpd, ((0, 0), (1, 1), (0, 0), (0, 0)))
    xh = jnp.stack([xrows[:, 0:Hp:TH], xrows[:, TH + 1:Hp + 2:TH]], axis=2)

    kernel = functools.partial(_bottleneck_kernel, W=W, pad_rows=pad_rows)

    out_p = pl.pallas_call(
        kernel,
        grid=(N, R),
        in_specs=[
            pl.BlockSpec((None, TH, Wp, Cinp), lambda n, i: (n, i, 0, 0)),
            pl.BlockSpec((None, None, 2, Wp, Cinp), lambda n, i: (n, i, 0, 0, 0)),
            pl.BlockSpec((Cinp, Cwp), lambda n, i: (0, 0)),
            pl.BlockSpec((1, Cwp), lambda n, i: (0, 0)),
            pl.BlockSpec((3, 3, Cwp, Cwp), lambda n, i: (0, 0, 0, 0)),
            pl.BlockSpec((1, Cwp), lambda n, i: (0, 0)),
            pl.BlockSpec((Cwp, Coutp), lambda n, i: (0, 0)),
            pl.BlockSpec((1, Coutp), lambda n, i: (0, 0)),
        ],
        out_specs=pl.BlockSpec((None, TH, Wp, Coutp), lambda n, i: (n, i, 0, 0)),
        out_shape=jax.ShapeDtypeStruct((N, Hp, Wp, Coutp), x_nhwc.dtype),
        scratch_shapes=[pltpu.VMEM((TH + 2, Wp, Cwp), jnp.bfloat16)],
        compiler_params=pltpu.CompilerParams(
            dimension_semantics=("parallel", "parallel"),
            vmem_limit_bytes=_vmem_limit_bytes(),
        ),
    )(xpd, xh, w1, b1, w2, b2, w3, b3)

    return out_p[:, :H, :W, :Cout]


def bottleneck_forward_pallas(x_nchw, p):
    # Thin NCHW adapter for parity with the PyTorch module only.  A real model
    # should stay NHWC end-to-end and call bottleneck_forward_nhwc directly to
    # avoid these layout transposes (each costs an extra HBM read+write).
    x_nhwc = jnp.transpose(x_nchw, (0, 2, 3, 1))
    out = bottleneck_forward_nhwc(x_nhwc, p)
    return jnp.transpose(out, (0, 3, 1, 2))


# ----------------------------- pure-JAX reference -----------------------------

def bottleneck_forward_ref(x, p):
    def conv(x, w, pad):
        return lax.conv_general_dilated(
            x, w, window_strides=(1, 1), padding=[(pad, pad), (pad, pad)],
            dimension_numbers=("NCHW", "OIHW", "NCHW"))

    def bn(x, bnp):
        g, b, m, v = bnp
        g, b, m, v = (t.reshape(1, -1, 1, 1) for t in (g, b, m, v))
        return (x - m) / jnp.sqrt(v + EPS) * g + b

    out = jax.nn.relu(bn(conv(x, p["w1"], 0), p["bn1"]))
    out = jax.nn.relu(bn(conv(out, p["w2"], 1), p["bn2"]))
    out = bn(conv(out, p["w3"], 0), p["bn3"])
    return jax.nn.relu(out + x)


# ----------------------------------- main -------------------------------------

if __name__ == "__main__":
    key = jax.random.PRNGKey(0)
    kx, kp, kx2, kp2 = jax.random.split(key, 4)

    planes = 4
    inplanes = planes * 4          # expansion*planes so the residual matches
    N, H, W = 2, 16, 16

    # ---- case 1: f32 activations, aligned spatial dims ----------------------
    x = jax.random.normal(kx, (N, inplanes, H, W), dtype=jnp.float32)
    params = init_params(kp, inplanes, planes)
    out = jax.block_until_ready(bottleneck_forward_pallas(x, params))
    ref = jax.block_until_ready(bottleneck_forward_ref(x, params))
    np.testing.assert_allclose(np.asarray(out), np.asarray(ref),
                               rtol=1e-2, atol=1e-2)

    # ---- case 2: ResNet-like ragged spatial dims (H = W = 14) ---------------
    # exercises the sublane (W) padding and row-tile (H) padding paths.
    x2 = jax.random.normal(kx2, (1, inplanes, 14, 14), dtype=jnp.float32)
    params2 = init_params(kp2, inplanes, planes)
    out2 = jax.block_until_ready(bottleneck_forward_pallas(x2, params2))
    ref2 = jax.block_until_ready(bottleneck_forward_ref(x2, params2))
    np.testing.assert_allclose(np.asarray(out2), np.asarray(ref2),
                               rtol=1e-2, atol=1e-2)

    # ---- case 3: bf16 NHWC I/O (the mem-bound v6e/v7x configuration) --------
    x_nhwc_bf16 = jnp.transpose(x, (0, 2, 3, 1)).astype(jnp.bfloat16)
    out_bf16 = jax.block_until_ready(
        bottleneck_forward_nhwc(x_nhwc_bf16, params))
    ref_nhwc = jnp.transpose(ref, (0, 2, 3, 1))
    np.testing.assert_allclose(
        np.asarray(out_bf16.astype(jnp.float32)), np.asarray(ref_nhwc),
        rtol=5e-2, atol=5e-2)

    print("KERNEL_OK")
</pallas_src>

<mosaic_0001>
module attributes {stable_mosaic.version = 11 : i64} {
  func.func @_bottleneck_kernel(%arg0: i32, %arg1: i32, %arg2: memref<1x8x16x128xf32, #tpu.memory_space<vmem>>, %arg3: memref<1x1x2x16x128xf32, #tpu.memory_space<vmem>>, %arg4: memref<128x128xbf16, #tpu.memory_space<vmem>>, %arg5: memref<1x128xf32, #tpu.memory_space<vmem>>, %arg6: memref<3x3x128x128xbf16, #tpu.memory_space<vmem>>, %arg7: memref<1x128xf32, #tpu.memory_space<vmem>>, %arg8: memref<128x128xbf16, #tpu.memory_space<vmem>>, %arg9: memref<1x128xf32, #tpu.memory_space<vmem>>, %arg10: memref<1x8x16x128xf32, #tpu.memory_space<vmem>>, %arg11: memref<10x16x128xbf16, #tpu.memory_space<vmem>>) attributes {dimension_semantics = [#tpu.dimension_semantics<parallel>, #tpu.dimension_semantics<parallel>], iteration_bounds = array<i64: 2, 2>, scalar_prefetch = 0 : i64, scratch_operands = 1 : i64, tpu.core_type = #tpu.core_type<tc>, window_params = [{transform_indices = @transform_0, window_bounds = array<i64: 1, 8, 16, 128>}, {transform_indices = @transform_1, window_bounds = array<i64: 1, 1, 2, 16, 128>}, {pipeline_mode = #tpu.pipeline_mode<synchronous>, transform_indices = @transform_2, window_bounds = array<i64: 128, 128>}, {pipeline_mode = #tpu.pipeline_mode<synchronous>, transform_indices = @transform_3, window_bounds = array<i64: 1, 128>}, {pipeline_mode = #tpu.pipeline_mode<synchronous>, transform_indices = @transform_4, window_bounds = array<i64: 3, 3, 128, 128>}, {pipeline_mode = #tpu.pipeline_mode<synchronous>, transform_indices = @transform_5, window_bounds = array<i64: 1, 128>}, {pipeline_mode = #tpu.pipeline_mode<synchronous>, transform_indices = @transform_6, window_bounds = array<i64: 128, 128>}, {pipeline_mode = #tpu.pipeline_mode<synchronous>, transform_indices = @transform_7, window_bounds = array<i64: 1, 128>}, {transform_indices = @transform_8, window_bounds = array<i64: 1, 8, 16, 128>}]} {
    %c0 = arith.constant 0 : index
    %c0_0 = arith.constant 0 : index
    %c0_1 = arith.constant 0 : index
    %c0_2 = arith.constant 0 : index
    %0 = vector.load %arg2[%c0, %c0_0, %c0_1, %c0_2] : memref<1x8x16x128xf32, #tpu.memory_space<vmem>>, vector<1x8x16x128xf32>
    %1 = vector.shape_cast %0 : vector<1x8x16x128xf32> to vector<8x16x128xf32>
    %2 = vector.shape_cast %1 : vector<8x16x128xf32> to vector<128x128xf32>
    %3 = arith.truncf %2 : vector<128x128xf32> to vector<128x128xbf16>
    %c0_3 = arith.constant 0 : index
    %c0_4 = arith.constant 0 : index
    %4 = vector.load %arg4[%c0_3, %c0_4] : memref<128x128xbf16, #tpu.memory_space<vmem>>, vector<128x128xbf16>
    %cst = arith.constant dense<0.000000e+00> : vector<128x128xf32>
    %5 = tpu.matmul %3, %4, %cst {dimension_numbers = #tpu.dot_dimension_numbers<[1], [0], [0], [1], [0, 0, 1, 1], [], []>} : vector<128x128xbf16>, vector<128x128xbf16>, vector<128x128xf32> -> vector<128x128xf32>
    %c0_5 = arith.constant 0 : index
    %c0_6 = arith.constant 0 : index
    %6 = vector.load %arg5[%c0_5, %c0_6] : memref<1x128xf32, #tpu.memory_space<vmem>>, vector<1x128xf32>
    %7 = vector.broadcast %6 : vector<1x128xf32> to vector<128x128xf32>
    %8 = arith.addf %5, %7 : vector<128x128xf32>
    %cst_7 = arith.constant 0.000000e+00 : f32
    %9 = vector.broadcast %cst_7 : f32 to vector<128x128xf32>
    %10 = arith.maximumf %8, %9 : vector<128x128xf32>
    %11 = arith.truncf %10 : vector<128x128xf32> to vector<128x128xbf16>
    %12 = vector.shape_cast %11 : vector<128x128xbf16> to vector<8x16x128xbf16>
    %c0_8 = arith.constant 0 : index
    %c0_9 = arith.constant 0 : index
    %c0_10 = arith.constant 0 : index
    %c0_11 = arith.constant 0 : index
    %c0_12 = arith.constant 0 : index
    %13 = vector.load %arg3[%c0_8, %c0_9, %c0_10, %c0_11, %c0_12] : memref<1x1x2x16x128xf32, #tpu.memory_space<vmem>>, vector<1x1x2x16x128xf32>
    %14 = vector.shape_cast %13 : vector<1x1x2x16x128xf32> to vector<2x16x128xf32>
    %15 = vector.shape_cast %14 : vector<2x16x128xf32> to vector<32x128xf32>
    %16 = arith.truncf %15 : vector<32x128xf32> to vector<32x128xbf16>
    %c0_13 = arith.constant 0 : index
    %c0_14 = arith.constant 0 : index
    %17 = vector.load %arg4[%c0_13, %c0_14] : memref<128x128xbf16, #tpu.memory_space<vmem>>, vector<128x128xbf16>
    %cst_15 = arith.constant dense<0.000000e+00> : vector<32x128xf32>
    %18 = tpu.matmul %16, %17, %cst_15 {dimension_numbers = #tpu.dot_dimension_numbers<[1], [0], [0], [1], [0, 0, 1, 1], [], []>} : vector<32x128xbf16>, vector<128x128xbf16>, vector<32x128xf32> -> vector<32x128xf32>
    %c0_16 = arith.constant 0 : index
    %c0_17 = arith.constant 0 : index
    %19 = vector.load %arg5[%c0_16, %c0_17] : memref<1x128xf32, #tpu.memory_space<vmem>>, vector<1x128xf32>
    %20 = vector.broadcast %19 : vector<1x128xf32> to vector<32x128xf32>
    %21 = arith.addf %18, %20 : vector<32x128xf32>
    %cst_18 = arith.constant 0.000000e+00 : f32
    %22 = vector.broadcast %cst_18 : f32 to vector<32x128xf32>
    %23 = arith.maximumf %21, %22 : vector<32x128xf32>
    %24 = arith.truncf %23 : vector<32x128xf32> to vector<32x128xbf16>
    %25 = vector.shape_cast %24 : vector<32x128xbf16> to vector<2x16x128xbf16>
    %c1 = arith.constant 1 : index
    %c0_19 = arith.constant 0 : index
    %c0_20 = arith.constant 0 : index
    %26 = vector.load %arg11[%c1, %c0_19, %c0_20] : memref<10x16x128xbf16, #tpu.memory_space<vmem>>, vector<8x16x128xbf16>
    tpu.vector_store %arg11[%c1, %c0_19, %c0_20], %12 {strides = array<i32>} : memref<10x16x128xbf16, #tpu.memory_space<vmem>>, vector<8x16x128xbf16>,
    %27 = vector.extract_strided_slice %25 {offsets = [0, 0, 0], sizes = [1, 16, 128], strides = [1, 1, 1]} : vector<2x16x128xbf16> to vector<1x16x128xbf16>
    %c0_21 = arith.constant 0 : index
    %c0_22 = arith.constant 0 : index
    %c0_23 = arith.constant 0 : index
    %28 = vector.load %arg11[%c0_21, %c0_22, %c0_23] : memref<10x16x128xbf16, #tpu.memory_space<vmem>>, vector<1x16x128xbf16>
    tpu.vector_store %arg11[%c0_21, %c0_22, %c0_23], %27 {strides = array<i32>} : memref<10x16x128xbf16, #tpu.memory_space<vmem>>, vector<1x16x128xbf16>,
    %29 = vector.extract_strided_slice %25 {offsets = [1, 0, 0], sizes = [1, 16, 128], strides = [1, 1, 1]} : vector<2x16x128xbf16> to vector<1x16x128xbf16>
    %c9 = arith.constant 9 : index
    %c0_24 = arith.constant 0 : index
    %c0_25 = arith.constant 0 : index
    %30 = vector.load %arg11[%c9, %c0_24, %c0_25] : memref<10x16x128xbf16, #tpu.memory_space<vmem>>, vector<1x16x128xbf16>
    tpu.vector_store %arg11[%c9, %c0_24, %c0_25], %29 {strides = array<i32>} : memref<10x16x128xbf16, #tpu.memory_space<vmem>>, vector<1x16x128xbf16>,
    %c0_i32 = arith.constant 0 : i32
    %31 = arith.cmpi eq, %arg1, %c0_i32 : i32
    %32 = arith.extui %31 : i1 to i32
    %c0_i32_26 = arith.constant 0 : i32
    %33 = arith.cmpi ne, %32, %c0_i32_26 : i32
    scf.if %33 {
      %cst_100 = arith.constant 0.000000e+00 : bf16
      %120 = vector.broadcast %cst_100 : bf16 to vector<1x16x128xbf16>
      %c0_101 = arith.constant 0 : index
      %c0_102 = arith.constant 0 : index
      %c0_103 = arith.constant 0 : index
      %121 = vector.load %arg11[%c0_101, %c0_102, %c0_103] : memref<10x16x128xbf16, #tpu.memory_space<vmem>>, vector<1x16x128xbf16>
      tpu.vector_store %arg11[%c0_101, %c0_102, %c0_103], %120 {strides = array<i32>} : memref<10x16x128xbf16, #tpu.memory_space<vmem>>, vector<1x16x128xbf16>,
    } else {
    }
    %c1_i32 = arith.constant 1 : i32
    %34 = arith.cmpi eq, %arg1, %c1_i32 : i32
    %35 = arith.extui %34 : i1 to i32
    %c0_i32_27 = arith.constant 0 : i32
    %36 = arith.cmpi ne, %35, %c0_i32_27 : i32
    scf.if %36 {
      %cst_100 = arith.constant 0.000000e+00 : bf16
      %120 = vector.broadcast %cst_100 : bf16 to vector<1x16x128xbf16>
      %c9_101 = arith.constant 9 : index
      %c0_102 = arith.constant 0 : index
      %c0_103 = arith.constant 0 : index
      %121 = vector.load %arg11[%c9_101, %c0_102, %c0_103] : memref<10x16x128xbf16, #tpu.memory_space<vmem>>, vector<1x16x128xbf16>
      tpu.vector_store %arg11[%c9_101, %c0_102, %c0_103], %120 {strides = array<i32>} : memref<10x16x128xbf16, #tpu.memory_space<vmem>>, vector<1x16x128xbf16>,
    } else {
    }
    %cst_28 = arith.constant 0.000000e+00 : bf16
    %37 = vector.broadcast %cst_28 : bf16 to vector<8x1x128xbf16>
    %cst_29 = arith.constant 0.000000e+00 : f32
    %38 = vector.broadcast %cst_29 : f32 to vector<128x128xf32>
    %c0_30 = arith.constant 0 : index
    %c0_31 = arith.constant 0 : index
    %c0_32 = arith.constant 0 : index
    %39 = vector.load %arg11[%c0_30, %c0_31, %c0_32] : memref<10x16x128xbf16, #tpu.memory_space<vmem>>, vector<8x16x128xbf16>
    %40 = vector.extract_strided_slice %39 {offsets = [0, 0, 0], sizes = [8, 15, 128], strides = [1, 1, 1]} : vector<8x16x128xbf16> to vector<8x15x128xbf16>
    %41 = tpu.concatenate %37, %40 in 1 : vector<8x1x128xbf16>, vector<8x15x128xbf16> -> vector<8x16x128xbf16>
    %42 = vector.extract_strided_slice %39 {offsets = [0, 1, 0], sizes = [8, 15, 128], strides = [1, 1, 1]} : vector<8x16x128xbf16> to vector<8x15x128xbf16>
    %43 = tpu.concatenate %42, %37 in 1 : vector<8x15x128xbf16>, vector<8x1x128xbf16> -> vector<8x16x128xbf16>
    %44 = vector.shape_cast %41 : vector<8x16x128xbf16> to vector<128x128xbf16>
    %c0_33 = arith.constant 0 : index
    %c0_34 = arith.constant 0 : index
    %c0_35 = arith.constant 0 : index
    %c0_36 = arith.constant 0 : index
    %45 = vector.load %arg6[%c0_33, %c0_34, %c0_35, %c0_36] : memref<3x3x128x128xbf16, #tpu.memory_space<vmem>>, vector<1x1x128x128xbf16>
    %46 = vector.shape_cast %45 : vector<1x1x128x128xbf16> to vector<128x128xbf16>
    %cst_37 = arith.constant dense<0.000000e+00> : vector<128x128xf32>
    %47 = tpu.matmul %44, %46, %cst_37 {dimension_numbers = #tpu.dot_dimension_numbers<[1], [0], [0], [1], [0, 0, 1, 1], [], []>} : vector<128x128xbf16>, vector<128x128xbf16>, vector<128x128xf32> -> vector<128x128xf32>
    %48 = arith.addf %38, %47 : vector<128x128xf32>
    %49 = vector.shape_cast %39 : vector<8x16x128xbf16> to vector<128x128xbf16>
    %c0_38 = arith.constant 0 : index
    %c1_39 = arith.constant 1 : index
    %c0_40 = arith.constant 0 : index
    %c0_41 = arith.constant 0 : index
    %50 = vector.load %arg6[%c0_38, %c1_39, %c0_40, %c0_41] : memref<3x3x128x128xbf16, #tpu.memory_space<vmem>>, vector<1x1x128x128xbf16>
    %51 = vector.shape_cast %50 : vector<1x1x128x128xbf16> to vector<128x128xbf16>
    %cst_42 = arith.constant dense<0.000000e+00> : vector<128x128xf32>
    %52 = tpu.matmul %49, %51, %cst_42 {dimension_numbers = #tpu.dot_dimension_numbers<[1], [0], [0], [1], [0, 0, 1, 1], [], []>} : vector<128x128xbf16>, vector<128x128xbf16>, vector<128x128xf32> -> vector<128x128xf32>
    %53 = arith.addf %48, %52 : vector<128x128xf32>
    %54 = vector.shape_cast %43 : vector<8x16x128xbf16> to vector<128x128xbf16>
    %c0_43 = arith.constant 0 : index
    %c2 = arith.constant 2 : index
    %c0_44 = arith.constant 0 : index
    %c0_45 = arith.constant 0 : index
    %55 = vector.load %arg6[%c0_43, %c2, %c0_44, %c0_45] : memref<3x3x128x128xbf16, #tpu.memory_space<vmem>>, vector<1x1x128x128xbf16>
    %56 = vector.shape_cast %55 : vector<1x1x128x128xbf16> to vector<128x128xbf16>
    %cst_46 = arith.constant dense<0.000000e+00> : vector<128x128xf32>
    %57 = tpu.matmul %54, %56, %cst_46 {dimension_numbers = #tpu.dot_dimension_numbers<[1], [0], [0], [1], [0, 0, 1, 1], [], []>} : vector<128x128xbf16>, vector<128x128xbf16>, vector<128x128xf32> -> vector<128x128xf32>
    %58 = arith.addf %53, %57 : vector<128x128xf32>
    %c1_47 = arith.constant 1 : index
    %c0_48 = arith.constant 0 : index
    %c0_49 = arith.constant 0 : index
    %59 = vector.load %arg11[%c1_47, %c0_48, %c0_49] : memref<10x16x128xbf16, #tpu.memory_space<vmem>>, vector<8x16x128xbf16>
    %60 = vector.extract_strided_slice %59 {offsets = [0, 0, 0], sizes = [8, 15, 128], strides = [1, 1, 1]} : vector<8x16x128xbf16> to vector<8x15x128xbf16>
    %61 = tpu.concatenate %37, %60 in 1 : vector<8x1x128xbf16>, vector<8x15x128xbf16> -> vector<8x16x128xbf16>
    %62 = vector.extract_strided_slice %59 {offsets = [0, 1, 0], sizes = [8, 15, 128], strides = [1, 1, 1]} : vector<8x16x128xbf16> to vector<8x15x128xbf16>
    %63 = tpu.concatenate %62, %37 in 1 : vector<8x15x128xbf16>, vector<8x1x128xbf16> -> vector<8x16x128xbf16>
    %64 = vector.shape_cast %61 : vector<8x16x128xbf16> to vector<128x128xbf16>
    %c1_50 = arith.constant 1 : index
    %c0_51 = arith.constant 0 : index
    %c0_52 = arith.constant 0 : index
    %c0_53 = arith.constant 0 : index
    %65 = vector.load %arg6[%c1_50, %c0_51, %c0_52, %c0_53] : memref<3x3x128x128xbf16, #tpu.memory_space<vmem>>, vector<1x1x128x128xbf16>
    %66 = vector.shape_cast %65 : vector<1x1x128x128xbf16> to vector<128x128xbf16>
    %cst_54 = arith.constant dense<0.000000e+00> : vector<128x128xf32>
    %67 = tpu.matmul %64, %66, %cst_54 {dimension_numbers = #tpu.dot_dimension_numbers<[1], [0], [0], [1], [0, 0, 1, 1], [], []>} : vector<128x128xbf16>, vector<128x128xbf16>, vector<128x128xf32> -> vector<128x128xf32>
    %68 = arith.addf %58, %67 : vector<128x128xf32>
    %69 = vector.shape_cast %59 : vector<8x16x128xbf16> to vector<128x128xbf16>
    %c1_55 = arith.constant 1 : index
    %c1_56 = arith.constant 1 : index
    %c0_57 = arith.constant 0 : index
    %c0_58 = arith.constant 0 : index
    %70 = vector.load %arg6[%c1_55, %c1_56, %c0_57, %c0_58] : memref<3x3x128x128xbf16, #tpu.memory_space<vmem>>, vector<1x1x128x128xbf16>
    %71 = vector.shape_cast %70 : vector<1x1x128x128xbf16> to vector<128x128xbf16>
    %cst_59 = arith.constant dense<0.000000e+00> : vector<128x128xf32>
    %72 = tpu.matmul %69, %71, %cst_59 {dimension_numbers = #tpu.dot_dimension_numbers<[1], [0], [0], [1], [0, 0, 1, 1], [], []>} : vector<128x128xbf16>, vector<128x128xbf16>, vector<128x128xf32> -> vector<128x128xf32>
    %73 = arith.addf %68, %72 : vector<128x128xf32>
    %74 = vector.shape_cast %63 : vector<8x16x128xbf16> to vector<128x128xbf16>
    %c1_60 = arith.constant 1 : index
    %c2_61 = arith.constant 2 : index
    %c0_62 = arith.constant 0 : index
    %c0_63 = arith.constant 0 : index
    %75 = vector.load %arg6[%c1_60, %c2_61, %c0_62, %c0_63] : memref<3x3x128x128xbf16, #tpu.memory_space<vmem>>, vector<1x1x128x128xbf16>
    %76 = vector.shape_cast %75 : vector<1x1x128x128xbf16> to vector<128x128xbf16>
    %cst_64 = arith.constant dense<0.000000e+00> : vector<128x128xf32>
    %77 = tpu.matmul %74, %76, %cst_64 {dimension_numbers = #tpu.dot_dimension_numbers<[1], [0], [0], [1], [0, 0, 1, 1], [], []>} : vector<128x128xbf16>, vector<128x128xbf16>, vector<128x128xf32> -> vector<128x128xf32>
    %78 = arith.addf %73, %77 : vector<128x128xf32>
    %c2_65 = arith.constant 2 : index
    %c0_66 = arith.constant 0 : index
    %c0_67 = arith.constant 0 : index
    %79 = vector.load %arg11[%c2_65, %c0_66, %c0_67] : memref<10x16x128xbf16, #tpu.memory_space<vmem>>, vector<8x16x128xbf16>
    %80 = vector.extract_strided_slice %79 {offsets = [0, 0, 0], sizes = [8, 15, 128], strides = [1, 1, 1]} : vector<8x16x128xbf16> to vector<8x15x128xbf16>
    %81 = tpu.concatenate %37, %80 in 1 : vector<8x1x128xbf16>, vector<8x15x128xbf16> -> vector<8x16x128xbf16>
    %82 = vector.extract_strided_slice %79 {offsets = [0, 1, 0], sizes = [8, 15, 128], strides = [1, 1, 1]} : vector<8x16x128xbf16> to vector<8x15x128xbf16>
    %83 = tpu.concatenate %82, %37 in 1 : vector<8x15x128xbf16>, vector<8x1x128xbf16> -> vector<8x16x128xbf16>
    %84 = vector.shape_cast %81 : vector<8x16x128xbf16> to vector<128x128xbf16>
    %c2_68 = arith.constant 2 : index
    %c0_69 = arith.constant 0 : index
    %c0_70 = arith.constant 0 : index
    %c0_71 = arith.constant 0 : index
    %85 = vector.load %arg6[%c2_68, %c0_69, %c0_70, %c0_71] : memref<3x3x128x128xbf16, #tpu.memory_space<vmem>>, vector<1x1x128x128xbf16>
    %86 = vector.shape_cast %85 : vector<1x1x128x128xbf16> to vector<128x128xbf16>
    %cst_72 = arith.constant dense<0.000000e+00> : vector<128x128xf32>
    %87 = tpu.matmul %84, %86, %cst_72 {dimension_numbers = #tpu.dot_dimension_numbers<[1], [0], [0], [1], [0, 0, 1, 1], [], []>} : vector<128x128xbf16>, vector<128x128xbf16>, vector<128x128xf32> -> vector<128x128xf32>
    %88 = arith.addf %78, %87 : vector<128x128xf32>
    %89 = vector.shape_cast %79 : vector<8x16x128xbf16> to vector<128x128xbf16>
    %c2_73 = arith.constant 2 : index
    %c1_74 = arith.constant 1 : index
    %c0_75 = arith.constant 0 : index
    %c0_76 = arith.constant 0 : index
    %90 = vector.load %arg6[%c2_73, %c1_74, %c0_75, %c0_76] : memref<3x3x128x128xbf16, #tpu.memory_space<vmem>>, vector<1x1x128x128xbf16>
    %91 = vector.shape_cast %90 : vector<1x1x128x128xbf16> to vector<128x128xbf16>
    %cst_77 = arith.constant dense<0.000000e+00> : vector<128x128xf32>
    %92 = tpu.matmul %89, %91, %cst_77 {dimension_numbers = #tpu.dot_dimension_numbers<[1], [0], [0], [1], [0, 0, 1, 1], [], []>} : vector<128x128xbf16>, vector<128x128xbf16>, vector<128x128xf32> -> vector<128x128xf32>
    %93 = arith.addf %88, %92 : vector<128x128xf32>
    %94 = vector.shape_cast %83 : vector<8x16x128xbf16> to vector<128x128xbf16>
    %c2_78 = arith.constant 2 : index
    %c2_79 = arith.constant 2 : index
    %c0_80 = arith.constant 0 : index
    %c0_81 = arith.constant 0 : index
    %95 = vector.load %arg6[%c2_78, %c2_79, %c0_80, %c0_81] : memref<3x3x128x128xbf16, #tpu.memory_space<vmem>>, vector<1x1x128x128xbf16>
    %96 = vector.shape_cast %95 : vector<1x1x128x128xbf16> to vector<128x128xbf16>
    %cst_82 = arith.constant dense<0.000000e+00> : vector<128x128xf32>
    %97 = tpu.matmul %94, %96, %cst_82 {dimension_numbers = #tpu.dot_dimension_numbers<[1], [0], [0], [1], [0, 0, 1, 1], [], []>} : vector<128x128xbf16>, vector<128x128xbf16>, vector<128x128xf32> -> vector<128x128xf32>
    %98 = arith.addf %93, %97 : vector<128x128xf32>
    %c0_83 = arith.constant 0 : index
    %c0_84 = arith.constant 0 : index
    %99 = vector.load %arg7[%c0_83, %c0_84] : memref<1x128xf32, #tpu.memory_space<vmem>>, vector<1x128xf32>
    %100 = vector.broadcast %99 : vector<1x128xf32> to vector<128x128xf32>
    %101 = arith.addf %98, %100 : vector<128x128xf32>
    %cst_85 = arith.constant 0.000000e+00 : f32
    %102 = vector.broadcast %cst_85 : f32 to vector<128x128xf32>
    %103 = arith.maximumf %101, %102 : vector<128x128xf32>
    %104 = arith.truncf %103 : vector<128x128xf32> to vector<128x128xbf16>
    %c0_86 = arith.constant 0 : index
    %c0_87 = arith.constant 0 : index
    %105 = vector.load %arg8[%c0_86, %c0_87] : memref<128x128xbf16, #tpu.memory_space<vmem>>, vector<128x128xbf16>
    %cst_88 = arith.constant dense<0.000000e+00> : vector<128x128xf32>
    %106 = tpu.matmul %104, %105, %cst_88 {dimension_numbers = #tpu.dot_dimension_numbers<[1], [0], [0], [1], [0, 0, 1, 1], [], []>} : vector<128x128xbf16>, vector<128x128xbf16>, vector<128x128xf32> -> vector<128x128xf32>
    %c0_89 = arith.constant 0 : index
    %c0_90 = arith.constant 0 : index
    %107 = vector.load %arg9[%c0_89, %c0_90] : memref<1x128xf32, #tpu.memory_space<vmem>>, vector<1x128xf32>
    %108 = vector.broadcast %107 : vector<1x128xf32> to vector<128x128xf32>
    %109 = arith.addf %106, %108 : vector<128x128xf32>
    %c0_91 = arith.constant 0 : index
    %c0_92 = arith.constant 0 : index
    %c0_93 = arith.constant 0 : index
    %c0_94 = arith.constant 0 : index
    %110 = vector.load %arg2[%c0_91, %c0_92, %c0_93, %c0_94] : memref<1x8x16x128xf32, #tpu.memory_space<vmem>>, vector<1x8x16x128xf32>
    %111 = vector.shape_cast %110 : vector<1x8x16x128xf32> to vector<8x16x128xf32>
    %112 = vector.shape_cast %111 : vector<8x16x128xf32> to vector<128x128xf32>
    %113 = arith.addf %109, %112 : vector<128x128xf32>
    %cst_95 = arith.constant 0.000000e+00 : f32
    %114 = vector.broadcast %cst_95 : f32 to vector<128x128xf32>
    %115 = arith.maximumf %113, %114 : vector<128x128xf32>
    %116 = vector.shape_cast %115 : vector<128x128xf32> to vector<8x16x128xf32>
    %c0_96 = arith.constant 0 : index
    %c0_97 = arith.constant 0 : index
    %c0_98 = arith.constant 0 : index
    %c0_99 = arith.constant 0 : index
    %117 = vector.load %arg10[%c0_96, %c0_97, %c0_98, %c0_99] : memref<1x8x16x128xf32, #tpu.memory_space<vmem>>, vector<1x8x16x128xf32>
    %118 = vector.shape_cast %117 : vector<1x8x16x128xf32> to vector<8x16x128xf32>
    %119 = vector.shape_cast %116 : vector<8x16x128xf32> to vector<1x8x16x128xf32>
    tpu.vector_store %arg10[%c0_96, %c0_97, %c0_98, %c0_99], %119 {strides = array<i32>} : memref<1x8x16x128xf32, #tpu.memory_space<vmem>>, vector<1x8x16x128xf32>,
    return
  }
  func.func @transform_0(%arg0: i32, %arg1: i32) -> (i32, i32, i32, i32) {
    %c0_i32 = arith.constant 0 : i32
    %c0_i32_0 = arith.constant 0 : i32
    %c0_i32_1 = arith.constant 0 : i32
    return %arg0, %arg1, %c0_i32, %c0_i32_0 : i32, i32, i32, i32
  }
  func.func @transform_1(%arg0: i32, %arg1: i32) -> (i32, i32, i32, i32, i32) {
    %c0_i32 = arith.constant 0 : i32
    %c0_i32_0 = arith.constant 0 : i32
    %c0_i32_1 = arith.constant 0 : i32
    %c0_i32_2 = arith.constant 0 : i32
    return %arg0, %arg1, %c0_i32, %c0_i32_0, %c0_i32_1 : i32, i32, i32, i32, i32
  }
  func.func @transform_2(%arg0: i32, %arg1: i32) -> (i32, i32) {
    %c0_i32 = arith.constant 0 : i32
    %c0_i32_0 = arith.constant 0 : i32
    %c0_i32_1 = arith.constant 0 : i32
    return %c0_i32, %c0_i32_0 : i32, i32
  }
  func.func @transform_3(%arg0: i32, %arg1: i32) -> (i32, i32) {
    %c0_i32 = arith.constant 0 : i32
    %c0_i32_0 = arith.constant 0 : i32
    %c0_i32_1 = arith.constant 0 : i32
    return %c0_i32, %c0_i32_0 : i32, i32
  }
  func.func @transform_4(%arg0: i32, %arg1: i32) -> (i32, i32, i32, i32) {
    %c0_i32 = arith.constant 0 : i32
    %c0_i32_0 = arith.constant 0 : i32
    %c0_i32_1 = arith.constant 0 : i32
    %c0_i32_2 = arith.constant 0 : i32
    %c0_i32_3 = arith.constant 0 : i32
    return %c0_i32, %c0_i32_0, %c0_i32_1, %c0_i32_2 : i32, i32, i32, i32
  }
  func.func @transform_5(%arg0: i32, %arg1: i32) -> (i32, i32) {
    %c0_i32 = arith.constant 0 : i32
    %c0_i32_0 = arith.constant 0 : i32
    %c0_i32_1 = arith.constant 0 : i32
    return %c0_i32, %c0_i32_0 : i32, i32
  }
  func.func @transform_6(%arg0: i32, %arg1: i32) -> (i32, i32) {
    %c0_i32 = arith.constant 0 : i32
    %c0_i32_0 = arith.constant 0 : i32
    %c0_i32_1 = arith.constant 0 : i32
    return %c0_i32, %c0_i32_0 : i32, i32
  }
  func.func @transform_7(%arg0: i32, %arg1: i32) -> (i32, i32) {
    %c0_i32 = arith.constant 0 : i32
    %c0_i32_0 = arith.constant 0 : i32
    %c0_i32_1 = arith.constant 0 : i32
    return %c0_i32, %c0_i32_0 : i32, i32
  }
  func.func @transform_8(%arg0: i32, %arg1: i32) -> (i32, i32, i32, i32) {
    %c0_i32 = arith.constant 0 : i32
    %c0_i32_0 = arith.constant 0 : i32
    %c0_i32_1 = arith.constant 0 : i32
    return %arg0, %arg1, %c0_i32, %c0_i32_0 : i32, i32, i32, i32
  }
}

</mosaic_0001>

<bundles_post_ra>
// kernel: tpu_custom_call.1
= control target key start
LH: loop header
LB: loop body
LE: loop exit
PB: predicated region body
PF: predicated region fallthrough
CT: control target
= control target key end

     0   :  { %s4595_s0 = inlined_call_operand.hbm [shape: f32[2,16,16,128], index: 0, kind: input, shape index: {}]   ;;  %s4596_s1 = inlined_call_operand.hbm [shape: f32[2,2,2,16,128], index: 1, kind: input, shape index: {}]   ;;  %s4597_s2 = inlined_call_operand.hbm [shape: bf16[128,128], index: 2, kind: input, shape index: {}]   ;;  %s4598_s3 = inlined_call_operand.vmem [shape: f32[1,128], index: 3, kind: input, shape index: {}]   ;;  %s4599_s4 = inlined_call_operand.hbm [shape: bf16[3,3,128,128], index: 4, kind: input, shape index: {}]   ;;  %s4600_s5 = inlined_call_operand.vmem [shape: f32[1,128], index: 5, kind: input, shape index: {}]   ;;  %s4601_s6 = inlined_call_operand.hbm [shape: bf16[128,128], index: 6, kind: input, shape index: {}]   ;;  %s4602_s7 = inlined_call_operand.vmem [shape: f32[1,128], index: 7, kind: input, shape index: {}]   ;;  %s4603_s8 = inlined_call_operand.hbm [shape: f32[2,16,16,128], index: 8, kind: output, shape index: {}]  }
   0x1   :  { %4612 = sst [smem:[#allocation26_spill]] %s4597_s2 }
   0x2   :  { %4613 = sst [smem:[#allocation27_spill]] %s4599_s4 }
   0x3   :  { %4614 = sst [smem:[#allocation28_spill]] %s4600_s5 }
   0x4   :  { %4615 = sst [smem:[#allocation29_spill]] %s4601_s6 }
   0x5   :  { %4616 = sst [smem:[#allocation30_spill]] %s4602_s7 }
   0x6   :  { %4617 = sst [smem:[#allocation31_spill]] %s4603_s8 }
   0x7   :  { %13 = vsyncpa [#allocation4], 0 }
   0x8   :  { %15 = vsyncpa [#allocation4 + $0x1], 0 }
   0x9   :  { %16 = vsyncpa [#allocation7], 0 }
   0xa   :  { %18 = vsyncpa [#allocation7 + $0x1], 0 }
   0xb   :  { %19 = vsyncpa [#allocation10], 0 }
   0xc   :  { %20 = vsyncpa [#allocation5], 0 }
   0xd   :  { %22 = vsyncpa [#allocation5 + $0x1], 0  ;;  %s3837_s27 = smov 0   ;;  %s3839_s28 = smov 0  }
   0xe   :  { %s3841_s29 = smov 0   ;;  %s3843_s30 = smov 0  }
   0xf   :  { %s3845_s9 = smov 0   ;;  %s3847_s10 = smov 0  }
  0x10   :  { %s3849_s11 = smov 0   ;;  %s3851_s12 = smov 0  }
  0x11 LB: > { %4618 = sst [smem:[#allocation18_spill]] %s3751_s27  ;;  %s3878_s13 = sadd.s32 4294967295, %s3779_s12   ;;  %s3779_s12 = sphi %s3851_s12, %s28_s12   ;;  %s3775_s11 = sphi %s3849_s11, %s4656_s11   ;;  %s3771_s10 = sphi %s3847_s10, %s4655_s10   ;;  %s3767_s9 = sphi %s3845_s9, %s4654_s9   ;;  %s3763_s30 = sphi %s3843_s30, %s4653_s30   ;;  %s3759_s29 = sphi %s3841_s29, %s4648_s29   ;;  %s3755_s28 = sphi %s3839_s28, %s4652_s28   ;;  %s3751_s27 = sphi %s3837_s27, %s4651_s27  }
  0x12   : > { %4619 = sst [smem:[#allocation19_spill]] %s3759_s29  ;;  %s2720_s14 = sadd.s32 4294967294, %s3779_s12  }
  0x13   : > { %4620 = sst [smem:[#allocation20_spill]] %s3767_s9  ;;  %p62_p0 = scmp.ne.s32.totalorder %s3755_s28, %s3751_s27 }
  0x14   : > { %p63_p1 = scmp.eq.s32.totalorder %s3878_s13, 0  ;;  %p242_p2 = scmp.eq.s32.totalorder %s3878_s13, 3 }
  0x15   : > { %p248_p3 = scmp.eq.s32.totalorder %s2720_s14, 3  ;;  %p2721_p5 = scmp.ge.s32.totalorder %s3779_s12, 1 }
  0x16   : > { %p3887_p4 = por %p63_p1, %p62_p0  ;;  %p255_p7 = scmp.lt.s32.totalorder %s3779_s12, 5 }
  0x17   : > { %p3892_p6 = por %p248_p3, %p62_p0  ;;  %s4624_s2 = sld [smem:[#allocation26_spill]] }
  0x18   : > { %p3900_p8 = pnand %p2721_p5, %p255_p7  ;;  %s3781_s21 = smov [#allocation8]  }
  0x19   : > { %s4622_s16 = scalar_select %p3892_p6, 1, 0 }
  0x1a   : > { %p3412_p9 = pneg %p3900_p8  ;;  %s268_s22 = sshll.u32 %s3781_s21, 4  ;;  %s269_s22 = int_to_ptr.vmem [resolvable:$true] %s268_s22 }
  0x1b   : > { %4623 = sst [smem:[#allocation21_spill]] %s4622_s16  ;;  %s3782_s14 = smov 64  }
  0x1c   : > { %p3908_p10 = pnand %p3412_p9, %p63_p1  ;;  %s4627_s4 = sld [smem:[#allocation27_spill]] }
  0x1d   : > { %s266_s19 = sshll.u32 %s4624_s2, 4  ;;  %s3783_s17 = smov 4   ;;  %s267_s19 = int_to_ptr.hbm [resolvable:$true] %s266_s19 }
  0x1e   : > { %3415 = dma.hbm_to_vmem [thread:$0]  (!%p3908_p10), %s267_s19, 1024, %s269_s22, [#allocation7], %s3782_s14, %s3782_s14, %s3783_s17  }
  0x1f   : > { %s3784_s18 = smov [#allocation9]   ;;  %s4628_s6 = sld [smem:[#allocation29_spill]] }
  0x20   : > { %s285_s21 = sshll.u32 %s3784_s18, 4  ;;  %s3785_s25 = smov [#allocation11]   ;;  %s286_s21 = int_to_ptr.vmem [resolvable:$true] %s285_s21 }
  0x21   : > { %s37_s19 = sadd.s32 1, %s3771_s10  ;;  %s40_s2 = sadd.s32 1, %s3775_s11 }
  0x22   : > { %s283_s26 = sshll.u32 %s4627_s4, 4  ;;  %s302_s4 = sshll.u32 %s3785_s25, 4  ;;  %s284_s26 = int_to_ptr.hbm [resolvable:$true] %s283_s26  ;;  %s303_s4 = int_to_ptr.vmem [resolvable:$true] %s302_s4 }
  0x23   : > { %3418 = dma.hbm_to_vmem [thread:$0]  (!%p3908_p10), %s284_s26, 9216, %s286_s21, [#allocation10], %s3782_s14, %s3782_s14, %s3783_s17  }
  0x24   : > { %p38_p11 = scmp.ge.s32.totalorder %s37_s19, 2  ;;  %s49_s16 = sadd.s32 1, %s3759_s29 }
  0x25   : > { %s300_s24 = sshll.u32 %s4628_s6, 4  ;;  %p56_p12 = scmp.ne.s32.totalorder %s3759_s29, %s3755_s28  ;;  %s301_s24 = int_to_ptr.hbm [resolvable:$true] %s300_s24 }
  0x26   : > { %3421 = dma.hbm_to_vmem [thread:$0]  (!%p3908_p10), %s301_s24, 1024, %s303_s4, [#allocation10], %s3782_s14, %s3782_s14, %s3783_s17  }
  0x27   : > { %s4658_s19 = smov (%p38_p11, %s37_s19), 0  ;;  %s4660_s2 = smov (!%p38_p11, %s40_s2), %s3775_s11 }
  0x28   : > { %4629 = sst [smem:[#allocation22_spill]] %s4658_s19  ;;  %s45_s22 = ssub.s32 %s3771_s10, %s4658_s19 }
  0x29   : > { %p57_p13 = scmp.eq.s32.totalorder %s3779_s12, 0  ;;  %p42_p0 = scmp.ge.s32.totalorder %s4660_s2, 2 }
  0x2a   : > { %p3937_p3 = por %p242_p2, %p56_p12  ;;  %p3436_p7 = scmp.lt.s32.totalorder %s3779_s12, 4 }
  0x2b   : > { %p3941_p5 = por %p57_p13, %p56_p12  ;;  %s4662_s2 = smov (%p42_p0, %s4660_s2), 0 }
  0x2c   : > { %s4630_s23 = scalar_select %p3937_p3, 1, 0 }
  0x2d   : > { %4633 = sst [smem:[#allocation24_spill]] %s4662_s2  ;;  %s319_s26 = sand.u32 1, %s3759_s29  }
  0x2e   : > { %4631 = sst [smem:[#allocation23_spill]] %s4630_s23  ;;  %s3199_s14 = sshll.u32 %s3771_s10, 4 }
  0x2f   : > { %s44_s17 = ssub.s32 %s3775_s11, %s4662_s2  ;;  %s2726_s21 = sshll.u32 %s319_s26, 7 }
  0x30   : > { %s46_s18 = sor.u32 %s45_s22, %s44_s17  ;;  %s2729_s24 = sshll.u32 %s3775_s11, 5 }
  0x31   : > { %p47_p9 = scmp.eq.s32.totalorder %s46_s18, 0  ;;  %s323_s25 = scalar_lea.vmem [#allocation3], %s2726_s21 }
  0x32   : > { %s334_s6 = sshll.u32 %s323_s25, 4  ;;  %s329_s27 = sadd.s32 %s3199_s14, %s2729_s24  ;;  %s335_s6 = int_to_ptr.vmem [resolvable:$true] %s334_s6 }
  0x33   : > { %s3954_s19 = scalar_select %p47_p9, %s3759_s29, %s49_s16  }
  0x34   : > { %s2730_s23 = sshll.u32 %s329_s27, 3  ;;  %p3960_p2 = pnand %p3436_p7, %p3941_p5 }
  0x35   : > { %4634 = sst [smem:[#allocation25_spill]] %s3954_s19  ;;  %s331_s18 = scalar_lea.hbm %s4595_s0, %s2730_s23 }
  0x36   : > { %s332_s21 = sshll.u32 %s331_s18, 4  ;;  %s320_s25 = scalar_lea.sflag [#allocation4], %s319_s26  ;;  %s333_s21 = int_to_ptr.hbm [resolvable:$true] %s332_s21 }
  0x37   : > { %s3786_s2 = smov 128   ;;  %s3787_s16 = smov 8  }
  0x38   : > { %3425 = dma.hbm_to_vmem [thread:$0]  (!%p3960_p2), %s333_s21, 2048, %s335_s6, %s320_s25, %s3786_s2, %s3786_s2, %s3787_s16  }
  0x39   : > { %s2731_s27 = sshll.u32 %s319_s26, 5  ;;  %s344_s4 = sand.u32 1, %s3779_s12  }
  0x3a   : > { %s2732_s14 = sshll.u32 %s3771_s10, 2  ;;  %s2733_s24 = sshll.u32 %s3775_s11, 3 }
  0x3b   : > { %s353_s19 = sadd.s32 %s2733_s24, %s2732_s14  ;;  %s348_s29 = scalar_lea.vmem [#allocation6], %s2731_s27 }
  0x3c   : > { %s358_s9 = sshll.u32 %s348_s29, 4  ;;  %s2734_s7 = sshll.u32 %s353_s19, 3  ;;  %s359_s9 = int_to_ptr.vmem [resolvable:$true] %s358_s9 }
  0x3d   : > { %s355_s23 = scalar_lea.hbm %s4596_s1, %s2734_s7  ;;  %s345_s18 = scalar_lea.sflag [#allocation7], %s344_s4 }
  0x3e   : > { %s356_s17 = sshll.u32 %s355_s23, 4  ;;  %370 = sbr.rel (%p3900_p8) target bundleno = 1055 (0x41f), region = 52  ;;  %s357_s17 = int_to_ptr.hbm [resolvable:$true] %s356_s17 }
  0x3f   : > { %3428 = dma.hbm_to_vmem [thread:$0]  (!%p3960_p2), %s357_s17, 512, %s359_s9, %s345_s18, %s3786_s2, %s3786_s2, %s3787_s16  }
  0x40   : > { %s3980_s6 = sand.u32 (!%p3900_p8), 1, %s3755_s28  }
  0x41   : > { %s2736_s29 = sshll.u32 (!%p3900_p8), %s3980_s6, 7  ;;  %s373_s19 = scalar_lea.sflag (!%p3900_p8), [#allocation4], %s3980_s6 }
  0x42   : > { %s3986_s5 = scalar_lea.vmem (!%p3900_p8), [#allocation3], %s2736_s29 }
  0x43   : > { %3730 = dma.done.wait (%p3887_p4), %s373_s19, 2048  }
  0x44   : > { %3732 = vsyncadd (%p3887_p4), %s373_s19, 4294965248  ;;  %s382_s7 = sand.u32 1, %s3878_s13   ;;  %s2737_s8 = sshll.u32 %s3980_s6, 5 }
  0x45   : > { %s383_s9 = scalar_lea.sflag [#allocation7], %s382_s7  ;;  %s3994_s20 = scalar_lea.vmem [#allocation6], %s2737_s8 }
  0x46   : > { %3734 = dma.done.wait (%p3887_p4), %s383_s9, 512  }
  0x47   : > { %3736 = vsyncadd (%p3887_p4), %s383_s9, 4294966784 }
  0x48   : > { %3738 = dma.done.wait (%p63_p1), [#allocation7], 1024  }
  0x49   : > { %3740 = vsyncadd (%p63_p1), [#allocation7], 4294966272 }
  0x4a   : > { %3742 = dma.done.wait (%p63_p1), [#allocation10], 10240  }
  0x4b   : > { %3744 = vsyncadd (%p63_p1), [#allocation10], 4294957056  ;;  %v3207_v0 = vld [vmem:[#allocation8 + $0x38] sm:$0xff]  ;;  %v3206_v1 = vld [vmem:[#allocation8 + $0x30] sm:$0xff]  ;;  %s4055_s2 = scalar_lea.vmem [#allocation12], %s2736_s29  ;;  %p2774_p1 = scmp.ne.s32.totalorder %s3763_s30, 0 }
  0x4c   : > { %535 = vmatpush.bf16.msra.mxu0 %v3207_v0  ;;  %622 = vmatpush.bf16.msra.mxu1 %v3207_v0  ;;  %v3205_v2 = vld [vmem:[#allocation8 + $0x28] sm:$0xff]  ;;  %v3204_v3 = vld [vmem:[#allocation8 + $0x20] sm:$0xff]  ;;  %v3203_v4 = vld [vmem:[#allocation8 + $0x18] sm:$0xff] }
  0x4d   : > { %v3202_v5 = vld [vmem:[#allocation8 + $0x10] sm:$0xff]  ;;  %v3201_v6 = vld [vmem:[#allocation8 + $0x8] sm:$0xff]  ;;  %v3200_v7 = vld [vmem:[#allocation8] sm:$0xff] }
  0x4e   : > { %v443_v8 = vld [vmem:[%s3986_s5] sm:$0xff]  ;;  %v444_v9 = vld [vmem:[%s3986_s5 + $0x8] sm:$0xff]  ;;  %v445_v11 = vld [vmem:[%s3986_s5 + $0x10] sm:$0xff] }
  0x4f   : > { %v459_v10 = vpack.c.bf16 %v444_v9, %v443_v8  ;;  %v446_v12 = vld [vmem:[%s3986_s5 + $0x18] sm:$0xff]  ;;  %v447_v14 = vld [vmem:[%s3986_s5 + $0x20] sm:$0xff]  ;;  %v448_v15 = vld [vmem:[%s3986_s5 + $0x28] sm:$0xff] }
  0x50   : > { %536 = vmatpush.bf16.msra.mxu0 %v3206_v1  ;;  %623 = vmatpush.bf16.msra.mxu1 %v3206_v1  ;;  %v460_v13 = vpack.c.bf16 %v446_v12, %v445_v11  ;;  %v461_v16 = vpack.c.bf16 %v448_v15, %v447_v14  ;;  %v449_v17 = vld [vmem:[%s3986_s5 + $0x30] sm:$0xff]  ;;  %v450_v18 = vld [vmem:[%s3986_s5 + $0x38] sm:$0xff]  ;;  %v616_v20 = vld [vmem:[%s3994_s20] sm:$0xff] }
  0x51   : > { %v462_v19 = vpack.c.bf16 %v450_v18, %v449_v17  ;;  %v617_v21 = vld [vmem:[%s3994_s20 + $0x8] sm:$0xff]  ;;  %v451_v23 = vld [vmem:[%s3986_s5 + $0x40] sm:$0xff]  ;;  %v618_v26 = vld [vmem:[%s3994_s20 + $0x10] sm:$0xff] }
  0x52   : > { %v620_v22 = vpack.c.bf16 %v617_v21, %v616_v20  ;;  %v452_v24 = vld [vmem:[%s3986_s5 + $0x48] sm:$0xff]  ;;  %v619_v27 = vld [vmem:[%s3994_s20 + $0x18] sm:$0xff]  ;;  %v453_v29 = vld [vmem:[%s3986_s5 + $0x50] sm:$0xff] }
  0x53   : > { %v463_v25 = vpack.c.bf16 %v452_v24, %v451_v23  ;;  %v621_v28 = vpack.c.bf16 %v619_v27, %v618_v26  ;;  %v454_v30 = vld [vmem:[%s3986_s5 + $0x58] sm:$0xff]  ;;  %v455_v32 = vld [vmem:[%s3986_s5 + $0x60] sm:$0xff]  ;;  %v456_v33 = vld [vmem:[%s3986_s5 + $0x68] sm:$0xff] }
  0x54   : > { %537 = vmatpush.bf16.msra.mxu0 %v3205_v2  ;;  %624 = vmatpush.bf16.msra.mxu1 %v3205_v2  ;;  %v464_v31 = vpack.c.bf16 %v454_v30, %v453_v29  ;;  %v465_v34 = vpack.c.bf16 %v456_v33, %v455_v32  ;;  %v457_v35 = vld [vmem:[%s3986_s5 + $0x70] sm:$0xff]  ;;  %v458_v36 = vld [vmem:[%s3986_s5 + $0x78] sm:$0xff] }
  0x55   : > { %v466_v37 = vpack.c.bf16 %v458_v36, %v457_v35  ;;  %v4031_v39 = vld [vmem:[%s4598_s3] ss:$0 sm:$0xff] }
  0x58   : > { %538 = vmatpush.bf16.msra.mxu0 %v3204_v3  ;;  %625 = vmatpush.bf16.msra.mxu1 %v3204_v3 }
  0x5c   : > { %539 = vmatpush.bf16.msra.mxu0 %v3203_v4  ;;  %626 = vmatpush.bf16.msra.mxu1 %v3203_v4 }
  0x60   : > { %540 = vmatpush.bf16.msra.mxu0 %v3202_v5  ;;  %627 = vmatpush.bf16.msra.mxu1 %v3202_v5 }
  0x64   : > { %541 = vmatpush.bf16.msra.mxu0 %v3201_v6  ;;  %628 = vmatpush.bf16.msra.mxu1 %v3201_v6 }
  0x68   : > { %542 = vmatpush.bf16.msra.mxu0 %v3200_v7  ;;  %629 = vmatpush.bf16.msra.mxu1 %v3200_v7 }
  0x6b   : > { %543 = vmatmul.bf16.vlgmr.msra.gmra.mxu0 %v459_v10  ;;  %630 = vmatmul.bf16.vlgmr.msra.gmra.mxu1 %v620_v22 }
  0x7b   : > { %548 = vmatmul.bf16.gmra.mxu0 %v460_v13  ;;  %635 = vmatmul.bf16.gmra.mxu1 %v621_v28 }
  0x8b   : > { %553 = vmatmul.bf16.gmra.mxu0 %v461_v16 }
  0x9b   : > { %558 = vmatmul.bf16.gmra.mxu0 %v462_v19 }
  0xab   : > { %563 = vmatmul.bf16.gmra.mxu0 %v463_v25 }
  0xbb   : > { %568 = vmatmul.bf16.gmra.mxu0 %v464_v31 }
  0xcb   : > { %573 = vmatmul.bf16.gmra.mxu0 %v465_v34 }
  0xdb   : > { %578 = vmatmul.bf16.gmra.mxu0 %v466_v37 }
  0xe8   : > { %v544_v38 = vpop.f32.mrf.mxu0  ;;  %v631_v63 = vpop.f32.mrf.mxu1 }
  0xe9   : > { %v545_v40 = vadd.f32 %v4031_v39, %v544_v38  ;;  %v632_v4 = vadd.f32 %v4031_v39, %v631_v63 }
  0xeb   : > { %v584_v43 = vmax.f32 %v545_v40, 0.0  ;;  %v641_v7 = vmax.f32 %v632_v4, 0.0 }
  0xf0   : > { %v546_v41 = vpop.f32.mrf.mxu0  ;;  %v633_v6 = vpop.f32.mrf.mxu1 }
  0xf1   : > { %v547_v42 = vadd.f32 %v4031_v39, %v546_v41  ;;  %v634_v8 = vadd.f32 %v4031_v39, %v633_v6 }
  0xf3   : > { %v585_v44 = vmax.f32 %v547_v42, 0.0  ;;  %v642_v9 = vmax.f32 %v634_v8, 0.0 }
  0xf5   : > { %v3316_v45 = vpack.c.bf16 %v585_v44, %v584_v43  ;;  %v3356_v10 = vpack.c.bf16 %v642_v9, %v641_v7 }
  0xf7   : > { %3317 = vst [vmem:[#allocation2 + $0x8] sm:$0xff] %v3316_v45  }
  0xf8   : > { %v549_v46 = vpop.f32.mrf.mxu0  ;;  %3357 = vst [vmem:[#allocation2] sm:$0xff] %v3356_v10   ;;  %v636_v13 = vpop.f32.mrf.mxu1 }
  0xf9   : > { %v550_v47 = vadd.f32 %v4031_v39, %v549_v46  ;;  %v637_v18 = vadd.f32 %v4031_v39, %v636_v13 }
  0xfb   : > { %v586_v50 = vmax.f32 %v550_v47, 0.0  ;;  %v643_v21 = vmax.f32 %v637_v18, 0.0 }
 0x100   : > { %v551_v48 = vpop.f32.mrf.mxu0  ;;  %v638_v20 = vpop.f32.mrf.mxu1 }
 0x101   : > { %v552_v49 = vadd.f32 %v4031_v39, %v551_v48  ;;  %v639_v22 = vadd.f32 %v4031_v39, %v638_v20 }
 0x103   : > { %v587_v51 = vmax.f32 %v552_v49, 0.0  ;;  %v644_v23 = vmax.f32 %v639_v22, 0.0 }
 0x105   : > { %v3321_v52 = vpack.c.bf16 %v587_v51, %v586_v50  ;;  %v3361_v24 = vpack.c.bf16 %v644_v23, %v643_v21 }
 0x107   : > { %3363 = vst [vmem:[#allocation2 + $0x10] sm:$0xff] %v3321_v52  }
 0x108   : > { %v554_v53 = vpop.f32.mrf.mxu0  ;;  %3362 = vst [vmem:[#allocation2 + $0x48] sm:$0xff] %v3361_v24  }
 0x109   : > { %v555_v54 = vadd.f32 %v4031_v39, %v554_v53 }
 0x10b   : > { %v588_v57 = vmax.f32 %v555_v54, 0.0 }
 0x110   : > { %v556_v55 = vpop.f32.mrf.mxu0 }
 0x111   : > { %v557_v56 = vadd.f32 %v4031_v39, %v556_v55 }
 0x113   : > { %v589_v58 = vmax.f32 %v557_v56, 0.0 }
 0x115   : > { %v3326_v59 = vpack.c.bf16 %v589_v58, %v588_v57 }
 0x117   : > { %3364 = vst [vmem:[#allocation2 + $0x18] sm:$0xff] %v3326_v59  }
 0x118   : > { %v559_v60 = vpop.f32.mrf.mxu0 }
 0x119   : > { %v560_v61 = vadd.f32 %v4031_v39, %v559_v60 }
 0x11b   : > { %v590_v1 = vmax.f32 %v560_v61, 0.0 }
 0x120   : > { %v561_v62 = vpop.f32.mrf.mxu0 }
 0x121   : > { %v562_v0 = vadd.f32 %v4031_v39, %v561_v62 }
 0x123   : > { %v591_v2 = vmax.f32 %v562_v0, 0.0 }
 0x125   : > { %v3331_v3 = vpack.c.bf16 %v591_v2, %v590_v1 }
 0x127   : > { %3365 = vst [vmem:[#allocation2 + $0x20] sm:$0xff] %v3331_v3  }
 0x128   : > { %v564_v5 = vpop.f32.mrf.mxu0 }
 0x129   : > { %v565_v11 = vadd.f32 %v4031_v39, %v564_v5 }
 0x12b   : > { %v592_v15 = vmax.f32 %v565_v11, 0.0 }
 0x130   : > { %v566_v12 = vpop.f32.mrf.mxu0 }
 0x131   : > { %v567_v14 = vadd.f32 %v4031_v39, %v566_v12 }
 0x133   : > { %v593_v16 = vmax.f32 %v567_v14, 0.0 }
 0x135   : > { %v3336_v17 = vpack.c.bf16 %v593_v16, %v592_v15 }
 0x137   : > { %3366 = vst [vmem:[#allocation2 + $0x28] sm:$0xff] %v3336_v17  }
 0x138   : > { %v569_v19 = vpop.f32.mrf.mxu0 }
 0x139   : > { %v570_v25 = vadd.f32 %v4031_v39, %v569_v19 }
 0x13b   : > { %v594_v28 = vmax.f32 %v570_v25, 0.0 }
 0x140   : > { %v571_v26 = vpop.f32.mrf.mxu0 }
 0x141   : > { %v572_v27 = vadd.f32 %v4031_v39, %v571_v26 }
 0x143   : > { %v595_v29 = vmax.f32 %v572_v27, 0.0 }
 0x145   : > { %v3341_v30 = vpack.c.bf16 %v595_v29, %v594_v28 }
 0x147   : > { %3367 = vst [vmem:[#allocation2 + $0x30] sm:$0xff] %v3341_v30  }
 0x148   : > { %v574_v31 = vpop.f32.mrf.mxu0 }
 0x149   : > { %v575_v32 = vadd.f32 %v4031_v39, %v574_v31 }
 0x14b   : > { %v596_v35 = vmax.f32 %v575_v32, 0.0 }
 0x150   : > { %v576_v33 = vpop.f32.mrf.mxu0 }
 0x151   : > { %v577_v34 = vadd.f32 %v4031_v39, %v576_v33 }
 0x153   : > { %v597_v36 = vmax.f32 %v577_v34, 0.0 }
 0x155   : > { %v3346_v37 = vpack.c.bf16 %v597_v36, %v596_v35 }
 0x157   : > { %3368 = vst [vmem:[#allocation2 + $0x38] sm:$0xff] %v3346_v37  }
 0x158   : > { %v579_v38 = vpop.f32.mrf.mxu0 }
 0x159   : > { %v580_v40 = vadd.f32 %v4031_v39, %v579_v38 }
 0x15b   : > { %v598_v43 = vmax.f32 %v580_v40, 0.0 }
 0x160   : > { %v581_v41 = vpop.f32.mrf.mxu0 }
 0x161   : > { %v582_v42 = vadd.f32 %v4031_v39, %v581_v41 }
 0x163   : > { %v599_v44 = vmax.f32 %v582_v42, 0.0  ;;  %674 = sbr.rel (%p2774_p1) target bundleno = 363 (0x16b), region = 76 }
 0x165   : > { %v3351_v45 = vpack.c.bf16 %v599_v44, %v598_v43 }
 0x167   : > { %3369 = vst [vmem:[#allocation2 + $0x40] sm:$0xff] %v3351_v45  }
 0x168   : > { %v3788_v46 = vmov 0  }
 0x169   : > { %675 = vst [vmem:[#allocation2] sm:$0xf] %v3788_v46 }
 0x16a   : > { %676 = vst [vmem:[#allocation2 + $0x4] sm:$0xf] %v3788_v46 }
 0x16b PF: > { %p2775_p4 = scmp.ne.s32.totalorder %s3763_s30, 1 }
 0x16d   : > { %680 = sbr.rel (%p2775_p4) target bundleno = 373 (0x175), region = 80 }
 0x172   : > { %v3789_v47 = vmov 0  }
 0x173   : > { %681 = vst [vmem:[#allocation2 + $0x48] sm:$0xf] %v3789_v47 }
 0x174   : > { %682 = vst [vmem:[#allocation2 + $0x4c] sm:$0xf] %v3789_v47 }
 0x175 PF: > { %v3231_v39 = vld [vmem:[#allocation9 + $0x78] sm:$0xff]  ;;  %v3230_v50 = vld [vmem:[#allocation9 + $0x70] sm:$0xff]  ;;  %v3229_v55 = vld [vmem:[#allocation9 + $0x68] sm:$0xff]  ;;  %vm803_vm0 = vcmask 1040384   ;;  %vm804_vm1 = vsmask.f32 256 }
 0x176   : > { %v3223_v48 = vld [vmem:[#allocation9 + $0x38] sm:$0xff]  ;;  %938 = vmatpush.bf16.msra.mxu2 %v3231_v39  ;;  %v3222_v51 = vld [vmem:[#allocation9 + $0x30] sm:$0xff]  ;;  %v3221_v56 = vld [vmem:[#allocation9 + $0x28] sm:$0xff]  ;;  %vm838_vm2 = vcmask 1047552   ;;  %vm839_vm3 = vsmask.f32 7424 }
 0x177   : > { %v3239_v49 = vld [vmem:[#allocation9 + $0xb8] sm:$0xff]  ;;  %1035 = vmatpush.bf16.msra.mxu3 %v3223_v48  ;;  %v3238_v52 = vld [vmem:[#allocation9 + $0xb0] sm:$0xff]  ;;  %v3237_v57 = vld [vmem:[#allocation9 + $0xa8] sm:$0xff]  ;;  %s4640_s25 = sld [smem:[#allocation28_spill]]  ;;  %s3312_s24 = sshll.u32 %s3763_s30, 4 }
 0x178   : > { %1149 = vmatpush.bf16.msrb.mxu1 %v3239_v49  ;;  %v3255_v53 = vld [vmem:[#allocation9 + $0xf8] sm:$0xff]  ;;  %v3254_v54 = vld [vmem:[#allocation9 + $0xf0] sm:$0xff]  ;;  %v3253_v58 = vld [vmem:[#allocation9 + $0xe8] sm:$0xff]  ;;  %s4641_s4 = sld [smem:[#allocation30_spill]]  ;;  %s2572_s30 = sshll.u32 %s4055_s2, 4  ;;  %s2573_s30 = int_to_ptr.vmem [resolvable:$true] %s2572_s30 }
 0x179   : > { %1439 = vmatpush.bf16.msrb.mxu0 %v3255_v53  ;;  %v3228_v59 = vld [vmem:[#allocation9 + $0x60] sm:$0xff]  ;;  %v3227_v63 = vld [vmem:[#allocation9 + $0x58] sm:$0xff]  ;;  %v3208_v1 = vld [vmem:[#allocation2] sm:$0xff]  ;;  %s4642_s14 = sld [smem:[#allocation20_spill]]  ;;  %s2557_s20 = scalar_lea.sflag [#allocation5], %s3980_s6 }
 0x17a   : > { %939 = vmatpush.bf16.msra.mxu2 %v3230_v50  ;;  %v3220_v60 = vld [vmem:[#allocation9 + $0x20] sm:$0xff]  ;;  %v3219_v0 = vld [vmem:[#allocation9 + $0x18] sm:$0xff]  ;;  %v3226_v4 = vld [vmem:[#allocation9 + $0x50] sm:$0xff]  ;;  %v740_v6 = vshrl.u32 %v3208_v1, 16  ;;  %v743_v9 = vshll.u32 %v3208_v1, 16  ;;  %s4643_s19 = sld [smem:[#allocation31_spill]] }
 0x17b   : > { %1036 = vmatpush.bf16.msra.mxu3 %v3222_v51  ;;  %v3236_v61 = vld [vmem:[#allocation9 + $0xa0] sm:$0xff]  ;;  %v3235_v2 = vld [vmem:[#allocation9 + $0x98] sm:$0xff]  ;;  %v3218_v5 = vld [vmem:[#allocation9 + $0x10] sm:$0xff] }
 0x17c   : > { %1150 = vmatpush.bf16.msrb.mxu1 %v3238_v52  ;;  %v3252_v62 = vld [vmem:[#allocation9 + $0xe0] sm:$0xff]  ;;  %v3251_v3 = vld [vmem:[#allocation9 + $0xd8] sm:$0xff]  ;;  %v3234_v8 = vld [vmem:[#allocation9 + $0x90] sm:$0xff]  ;;  %v742_v13 = vrot.slane %v740_v6, 7  ;;  %v814_v16 = vrot.slane %v743_v9, 1 }
 0x17d   : > { %1440 = vmatpush.bf16.msrb.mxu0 %v3254_v54  ;;  %v4059_v7 = vld [vmem:[#allocation2 + $0x8] sm:$0xff]  ;;  %v3250_v10 = vld [vmem:[#allocation9 + $0xd0] sm:$0xff]  ;;  %v3225_v11 = vld [vmem:[#allocation9 + $0x48] sm:$0xff] }
 0x17e   : > { %940 = vmatpush.bf16.msra.mxu2 %v3229_v55  ;;  %v3217_v12 = vld [vmem:[#allocation9 + $0x8] sm:$0xff]  ;;  %v1271_v14 = vshrl.u32 %v4059_v7, 16  ;;  %v3224_v18 = vld [vmem:[#allocation9 + $0x40] sm:$0xff]  ;;  %v745_v20 = vor.u32 %v743_v9, %v742_v13  ;;  %v1274_v22 = vshll.u32 %v4059_v7, 16  ;;  %vm4066_vm4 = vmand %vm803_vm0, %vm804_vm1  ;;  %v815_v25 = vor.u32 %v814_v16, %v740_v6 }
 0x17f   : > { %1037 = vmatpush.bf16.msra.mxu3 %v3221_v56  ;;  %v3233_v15 = vld [vmem:[#allocation9 + $0x88] sm:$0xff]  ;;  %v3216_v19 = vld [vmem:[#allocation9] sm:$0xff]  ;;  %v3263_v26 = vld [vmem:[#allocation9 + $0x138] sm:$0xff]  ;;  %s3195_s22 = sshll.u32 %s4642_s14, 5 }
 0x180   : > { %1151 = vmatpush.bf16.msrb.mxu1 %v3237_v57  ;;  %v3249_v17 = vld [vmem:[#allocation9 + $0xc8] sm:$0xff]  ;;  %v1273_v21 = vrot.slane %v1271_v14, 7  ;;  %v3232_v23 = vld [vmem:[#allocation9 + $0x80] sm:$0xff]  ;;  %vm4071_vm5 = vmand %vm838_vm2, %vm839_vm3  ;;  %v806_v28 = vsel %vm4066_vm4, 0, %v745_v20  ;;  %s2569_s23 = sadd.s32 %s3312_s24, %s3195_s22 }
 0x181   : > { %1441 = vmatpush.bf16.msrb.mxu0 %v3253_v58  ;;  %v3248_v29 = vld [vmem:[#allocation9 + $0xc0] sm:$0xff]  ;;  %v3209_v31 = vld [vmem:[#allocation2 + $0x8] sm:$0xff]  ;;  %v841_v32 = vsel %vm4071_vm5, %v815_v25, 0  ;;  %v3262_v33 = vld [vmem:[#allocation9 + $0x130] sm:$0xff]  ;;  %s3196_s17 = sshll.u32 %s2569_s23, 3 }
 0x182   : > { %941 = vmatpush.bf16.msra.mxu2 %v3228_v59  ;;  %v1276_v30 = vor.u32 %v1274_v22, %v1273_v21  ;;  %v747_v35 = vshrl.u32 %v3209_v31, 16  ;;  %v4083_v36 = vld [vmem:[#allocation2 + $0x10] sm:$0xff]  ;;  %v750_v37 = vshll.u32 %v3209_v31, 16  ;;  %v3261_v38 = vld [vmem:[#allocation9 + $0x128] sm:$0xff]  ;;  %v3258_v25 = vld [vmem:[#allocation9 + $0x110] sm:$0xff]  ;;  %s2571_s7 = scalar_lea.hbm %s4643_s19, %s3196_s17 }
 0x183   : > { %1038 = vmatpush.bf16.msra.mxu3 %v3220_v60  ;;  %v1278_v41 = vshrl.u32 %v4083_v36, 16  ;;  %v1281_v45 = vshll.u32 %v4083_v36, 16  ;;  %v3210_v48 = vld [vmem:[#allocation2 + $0x10] sm:$0xff]  ;;  %v4097_v52 = vld [vmem:[#allocation2 + $0x18] sm:$0xff]  ;;  %s2574_s9 = sshll.u32 %s2571_s7, 4  ;;  %s2575_s9 = int_to_ptr.hbm [resolvable:$true] %s2574_s9 }
 0x184   : > { %1152 = vmatpush.bf16.msrb.mxu1 %v3236_v61  ;;  %v1334_v34 = vsel %vm4066_vm4, 0, %v1276_v30  ;;  %v749_v40 = vrot.slane %v747_v35, 7  ;;  %v816_v42 = vrot.slane %v750_v37, 1  ;;  %v754_v51 = vshrl.u32 %v3210_v48, 16  ;;  %v3260_v53 = vld [vmem:[#allocation9 + $0x120] sm:$0xff]  ;;  %s3683_s13 = sshra.s32 %s2575_s9, 4  ;;  %s3684_s13 = int_to_ptr.hbm [resolvable:$true] %s3683_s13 }
 0x185   : > { %1442 = vmatpush.bf16.msrb.mxu0 %v3252_v62  ;;  %v1280_v44 = vrot.slane %v1278_v41, 7  ;;  %v757_v54 = vshll.u32 %v3210_v48, 16  ;;  %v1285_v56 = vshrl.u32 %v4097_v52, 16  ;;  %v1288_v60 = vshll.u32 %v4097_v52, 16  ;;  %s3685_s15 = scalar_lea.hbm %s3684_s13, 128  ;;  %p3690_p12 = scmp.lt.s32.totalorder %s3684_s13, %s4643_s19 }
 0x186   : > { %942 = vmatpush.bf16.msra.mxu2 %v3227_v63  ;;  %v752_v43 = vor.u32 %v750_v37, %v749_v40  ;;  %v817_v46 = vor.u32 %v816_v42, %v747_v35  ;;  %v756_v55 = vrot.slane %v754_v51, 7  ;;  %v3213_v40 = vld [vmem:[#allocation2 + $0x28] sm:$0xff]  ;;  %p3686_p8 = scmp.ne.s32.totalorder %s3684_s13, %s3685_s15 }
 0x187   : > { %1039 = vmatpush.bf16.msra.mxu3 %v3219_v0  ;;  %v1283_v39 = vor.u32 %v1281_v45, %v1280_v44  ;;  %v818_v57 = vrot.slane %v757_v54, 1  ;;  %v1287_v59 = vrot.slane %v1285_v56, 7  ;;  %v3211_v0 = vld [vmem:[#allocation2 + $0x18] sm:$0xff] }
 0x188   : > { %1153 = vmatpush.bf16.msrb.mxu1 %v3235_v2  ;;  %v807_v47 = vsel %vm4066_vm4, 0, %v752_v43  ;;  %v842_v49 = vsel %vm4071_vm5, %v817_v46, 0  ;;  %v759_v58 = vor.u32 %v757_v54, %v756_v55  ;;  %v764_v6 = vshll.u32 %v3211_v0, 16  ;;  %v4137_v43 = vld [vmem:[#allocation2 + $0x30] sm:$0xff]  ;;  %p3687_p10 = pnand %p3686_p8, %p3937_p3 }
 0x189   : > { %1443 = vmatpush.bf16.msrb.mxu0 %v3251_v3  ;;  %v1335_v50 = vsel %vm4066_vm4, 0, %v1283_v39  ;;  %v819_v61 = vor.u32 %v818_v57, %v754_v51  ;;  %v1290_v63 = vor.u32 %v1288_v60, %v1287_v59  ;;  %v761_v3 = vshrl.u32 %v3211_v0, 16  ;;  %v3271_v39 = vld [vmem:[#allocation9 + $0x178] sm:$0xff]  ;;  %v3285_v51 = vld [vmem:[#allocation9 + $0x1a8] sm:$0xff]  ;;  %v3284_v59 = vld [vmem:[#allocation9 + $0x1a0] sm:$0xff] }
 0x18a   : > { %943 = vmatpush.bf16.msra.mxu2 %v3226_v4  ;;  %v808_v62 = vsel %vm4066_vm4, 0, %v759_v58  ;;  %v4111_v4 = vld [vmem:[#allocation2 + $0x20] sm:$0xff]  ;;  %v775_v46 = vshrl.u32 %v3213_v40, 16  ;;  %v1306_v55 = vshrl.u32 %v4137_v43, 16  ;;  %v3269_v58 = vld [vmem:[#allocation9 + $0x168] sm:$0xff]  ;;  %p3688_p11 = pneg %p3687_p10 }
 0x18b   : > { %1040 = vmatpush.bf16.msra.mxu3 %v3218_v5  ;;  %v1336_v2 = vsel %vm4066_vm4, 0, %v1290_v63  ;;  %v3259_v5 = vld [vmem:[#allocation9 + $0x118] sm:$0xff]  ;;  %v1292_v9 = vshrl.u32 %v4111_v4, 16  ;;  %v1295_v13 = vshll.u32 %v4111_v4, 16  ;;  %v1309_v63 = vshll.u32 %v4137_v43, 16 }
 0x18c   : > { %1154 = vmatpush.bf16.msrb.mxu1 %v3234_v8  ;;  %v763_v8 = vrot.slane %v761_v3, 7  ;;  %v777_v54 = vrot.slane %v775_v46, 7 }
 0x18d   : > { %1444 = vmatpush.bf16.msrb.mxu0 %v3250_v10  ;;  %v820_v10 = vrot.slane %v764_v6, 1 }
 0x18e   : > { %944 = vmatpush.bf16.msra.mxu2 %v3225_v11  ;;  %v766_v11 = vor.u32 %v764_v6, %v763_v8  ;;  %v3283_v8 = vld [vmem:[#allocation9 + $0x198] sm:$0xff] }
 0x18f   : > { %1041 = vmatpush.bf16.msra.mxu3 %v3217_v12  ;;  %v1294_v12 = vrot.slane %v1292_v9, 7 }
 0x190   : > { %1155 = vmatpush.bf16.msrb.mxu1 %v3233_v15  ;;  %v821_v15 = vor.u32 %v820_v10, %v761_v3  ;;  %v809_v16 = vsel %vm4066_vm4, 0, %v766_v11  ;;  %v3294_v10 = vld [vmem:[#allocation9 + $0x1f0] sm:$0xff] }
 0x191   : > { %1445 = vmatpush.bf16.msrb.mxu0 %v3249_v17  ;;  %v1297_v17 = vor.u32 %v1295_v13, %v1294_v12 }
 0x192   : > { %945 = vmatpush.bf16.msra.mxu2 %v3224_v18  ;;  %v3212_v18 = vld [vmem:[#allocation2 + $0x20] sm:$0xff] }
 0x193   : > { %1042 = vmatpush.bf16.msra.mxu3 %v3216_v19  ;;  %v844_v19 = vsel %vm4071_vm5, %v821_v15, 0  ;;  %v1337_v20 = vsel %vm4066_vm4, 0, %v1297_v17  ;;  %v768_v21 = vshrl.u32 %v3212_v18, 16  ;;  %v4156_v15 = vld [vmem:[#allocation2 + $0x38] sm:$0xff]  ;;  %v3267_v17 = vld [vmem:[#allocation9 + $0x158] sm:$0xff] }
 0x194   : > { %1156 = vmatpush.bf16.msrb.mxu1 %v3232_v23  ;;  %v4125_v23 = vld [vmem:[#allocation2 + $0x28] sm:$0xff] }
 0x195   : > { %946 = vmatmul.bf16.vlgmr.msra.gmra.mxu2 %v3208_v1  ;;  %1446 = vmatpush.bf16.msrb.mxu0 %v3248_v29  ;;  %v843_v1 = vsel %vm4071_vm5, %v819_v61, 0  ;;  %v770_v29 = vrot.slane %v768_v21, 7  ;;  %v1299_v30 = vshrl.u32 %v4125_v23, 16 }
 0x196   : > { %1577 = vmatpush.bf16.msrb.mxu2 %v3263_v26  ;;  %1043 = vmatmul.bf16.vlgmr.msra.gmra.mxu3 %v806_v28  ;;  %v771_v26 = vshll.u32 %v3212_v18, 16  ;;  %v3287_v28 = vld [vmem:[#allocation9 + $0x1b8] sm:$0xff] }
 0x197   : > { %1157 = vmatmul.bf16.vlgmr.msrb.gmra.mxu1 %v841_v32  ;;  %1707 = vmatpush.bf16.msrb.mxu3 %v3271_v39 }
 0x198   : > { %1447 = vmatmul.bf16.vlgmr.msrb.gmra.mxu0 %v1334_v34  ;;  %1998 = vmatpush.bf16.msra.mxu1 %v3287_v28  ;;  %v773_v32 = vor.u32 %v771_v26, %v770_v29  ;;  %v1302_v34 = vshll.u32 %v4125_v23, 16  ;;  %v3281_v29 = vld [vmem:[#allocation9 + $0x188] sm:$0xff] }
 0x19a   : > { %1578 = vmatpush.bf16.msrb.mxu2 %v3262_v33  ;;  %v1301_v33 = vrot.slane %v1299_v30, 7  ;;  %v810_v37 = vsel %vm4066_vm4, 0, %v773_v32  ;;  %v3265_v32 = vld [vmem:[#allocation9 + $0x148] sm:$0xff] }
 0x19e   : > { %1579 = vmatpush.bf16.msrb.mxu2 %v3261_v38  ;;  %v1304_v38 = vor.u32 %v1302_v34, %v1301_v33 }
 0x1a0   : > { %v1338_v44 = vsel %vm4066_vm4, 0, %v1304_v38 }
 0x1a2   : > { %1580 = vmatpush.bf16.msrb.mxu2 %v3260_v53  ;;  %v4141_v53 = vld [vmem:[#allocation9 + $0x1f8] sm:$0xff] }
 0x1a3   : > { %2136 = vmatpush.bf16.msra.mxu0 %v4141_v53 }
 0x1a5   : > { %951 = vmatmul.bf16.gmra.mxu2 %v3209_v31  ;;  %v822_v31 = vrot.slane %v771_v26, 1  ;;  %v1313_v26 = vshrl.u32 %v4156_v15, 16 }
 0x1a6   : > { %1048 = vmatmul.bf16.gmra.mxu3 %v807_v47  ;;  %1581 = vmatpush.bf16.msrb.mxu2 %v3259_v5  ;;  %v3257_v47 = vld [vmem:[#allocation9 + $0x108] sm:$0xff]  ;;  %v3214_v5 = vld [vmem:[#allocation2 + $0x30] sm:$0xff] }
 0x1a7   : > { %1162 = vmatmul.bf16.gmra.mxu1 %v842_v49  ;;  %v823_v35 = vor.u32 %v822_v31, %v768_v21  ;;  %v778_v49 = vshll.u32 %v3213_v40, 16  ;;  %v782_v12 = vshrl.u32 %v3214_v5, 16  ;;  %2137 = vmatpush.bf16.msra.mxu0 %v3294_v10  ;;  %v3266_v21 = vld [vmem:[#allocation9 + $0x150] sm:$0xff]  ;;  %v3292_v31 = vld [vmem:[#allocation9 + $0x1e0] sm:$0xff] }
 0x1a8   : > { %1452 = vmatmul.bf16.gmra.mxu0 %v1335_v50  ;;  %v3270_v50 = vld [vmem:[#allocation9 + $0x170] sm:$0xff] }
 0x1a9   : > { %v845_v42 = vsel %vm4071_vm5, %v823_v35, 0  ;;  %v824_v57 = vrot.slane %v778_v49, 1  ;;  %1708 = vmatpush.bf16.msrb.mxu3 %v3270_v50  ;;  %v780_v61 = vor.u32 %v778_v49, %v777_v54  ;;  %v1315_v35 = vrot.slane %v1313_v26, 7  ;;  %v3290_v49 = vld [vmem:[#allocation9 + $0x1d0] sm:$0xff] }
 0x1aa   : > { %1582 = vmatpush.bf16.msrb.mxu2 %v3258_v25  ;;  %v784_v25 = vrot.slane %v782_v12, 7  ;;  %v4171_v54 = vld [vmem:[#allocation2 + $0x40] sm:$0xff] }
 0x1ad   : > { %1709 = vmatpush.bf16.msrb.mxu3 %v3269_v58 }
 0x1ae   : > { %1583 = vmatpush.bf16.msrb.mxu2 %v3257_v47  ;;  %v3215_v47 = vld [vmem:[#allocation2 + $0x38] sm:$0xff] }
 0x1af   : > { %v792_v58 = vshll.u32 %v3215_v47, 16 }
 0x1b5   : > { %956 = vmatmul.bf16.gmra.mxu2 %v3210_v48  ;;  %v3286_v48 = vld [vmem:[#allocation9 + $0x1b0] sm:$0xff] }
 0x1b6   : > { %1053 = vmatmul.bf16.gmra.mxu3 %v808_v62  ;;  %1999 = vmatpush.bf16.msra.mxu1 %v3286_v48  ;;  %v1308_v62 = vrot.slane %v1306_v55, 7  ;;  %v3264_v48 = vld [vmem:[#allocation9 + $0x140] sm:$0xff] }
 0x1b7   : > { %1167 = vmatmul.bf16.gmra.mxu1 %v843_v1  ;;  %v3268_v1 = vld [vmem:[#allocation9 + $0x160] sm:$0xff] }
 0x1b8   : > { %1457 = vmatmul.bf16.gmra.mxu0 %v1336_v2  ;;  %v811_v2 = vsel %vm4066_vm4, 0, %v780_v61  ;;  %v1311_v3 = vor.u32 %v1309_v63, %v1308_v62  ;;  %1710 = vmatpush.bf16.msrb.mxu3 %v3268_v1  ;;  %v828_v62 = vrot.slane %v792_v58, 1 }
 0x1ba   : > { %2000 = vmatpush.bf16.msra.mxu1 %v3285_v51  ;;  %v1339_v11 = vsel %vm4066_vm4, 0, %v1311_v3  ;;  %v789_v51 = vshrl.u32 %v3215_v47, 16  ;;  %v1323_v3 = vshll.u32 %v4171_v54, 16 }
 0x1bc   : > { %1711 = vmatpush.bf16.msrb.mxu3 %v3267_v17  ;;  %v791_v61 = vrot.slane %v789_v51, 7 }
 0x1be   : > { %2001 = vmatpush.bf16.msra.mxu1 %v3284_v59  ;;  %v3289_v59 = vld [vmem:[#allocation9 + $0x1c8] sm:$0xff]  ;;  %v794_v1 = vor.u32 %v792_v58, %v791_v61 }
 0x1c0   : > { %1712 = vmatpush.bf16.msrb.mxu3 %v3266_v21 }
 0x1c2   : > { %2002 = vmatpush.bf16.msra.mxu1 %v3283_v8 }
 0x1c4   : > { %1713 = vmatpush.bf16.msrb.mxu3 %v3265_v32 }
 0x1c5   : > { %961 = vmatmul.bf16.gmra.mxu2 %v3211_v0  ;;  %v825_v0 = vor.u32 %v824_v57, %v775_v46  ;;  %v3303_v57 = vld [vmem:[#allocation9 + $0x238] sm:$0xff] }
 0x1c6   : > { %1058 = vmatmul.bf16.gmra.mxu3 %v809_v16  ;;  %v3256_v16 = vld [vmem:[#allocation9 + $0x100] sm:$0xff] }
 0x1c7   : > { %1172 = vmatmul.bf16.gmra.mxu1 %v844_v19  ;;  %v846_v6 = vsel %vm4071_vm5, %v825_v0, 0  ;;  %v3282_v19 = vld [vmem:[#allocation9 + $0x190] sm:$0xff]  ;;  %1584 = vmatpush.bf16.msrb.mxu2 %v3256_v16  ;;  %v3288_v0 = vld [vmem:[#allocation9 + $0x1c0] sm:$0xff] }
 0x1c8   : > { %1462 = vmatmul.bf16.gmra.mxu0 %v1337_v20  ;;  %v3293_v20 = vld [vmem:[#allocation9 + $0x1e8] sm:$0xff]  ;;  %2003 = vmatpush.bf16.msra.mxu1 %v3282_v19  ;;  %v3302_v16 = vld [vmem:[#allocation9 + $0x230] sm:$0xff] }
 0x1c9   : > { %2138 = vmatpush.bf16.msra.mxu0 %v3293_v20  ;;  %1714 = vmatpush.bf16.msrb.mxu3 %v3264_v48 }
 0x1cb   : > { %3378 = vmatpush.bf16.msra.mxu2 %v3303_v57 }
 0x1cc   : > { %2004 = vmatpush.bf16.msra.mxu1 %v3281_v29 }
 0x1cd   : > { %2139 = vmatpush.bf16.msra.mxu0 %v3292_v31 }
 0x1cf   : > { %3379 = vmatpush.bf16.msra.mxu2 %v3302_v16 }
 0x1d5   : > { %966 = vmatmul.bf16.gmra.mxu2 %v3212_v18  ;;  %v785_v18 = vshll.u32 %v3214_v5, 16 }
 0x1d6   : > { %1063 = vmatmul.bf16.gmra.mxu3 %v810_v37  ;;  %v1316_v37 = vshll.u32 %v4156_v15, 16 }
 0x1d7   : > { %1177 = vmatmul.bf16.gmra.mxu1 %v845_v42  ;;  %v826_v28 = vrot.slane %v785_v18, 1  ;;  %v787_v33 = vor.u32 %v785_v18, %v784_v25  ;;  %v3291_v42 = vld [vmem:[#allocation9 + $0x1d8] sm:$0xff]  ;;  %v1342_v18 = vrot.slane %v1274_v22, 1 }
 0x1d8   : > { %1467 = vmatmul.bf16.gmra.mxu0 %v1338_v44  ;;  %v1318_v46 = vor.u32 %v1316_v37, %v1315_v35 }
 0x1d9   : > { %v827_v38 = vor.u32 %v826_v28, %v782_v12  ;;  %v812_v44 = vsel %vm4066_vm4, 0, %v787_v33  ;;  %2140 = vmatpush.bf16.msra.mxu0 %v3291_v42  ;;  %v1343_v21 = vor.u32 %v1342_v18, %v1271_v14  ;;  %v3301_v33 = vld [vmem:[#allocation9 + $0x228] sm:$0xff] }
 0x1da   : > { %v1340_v50 = vsel %vm4066_vm4, 0, %v1318_v46  ;;  %3380 = vmatpush.bf16.msra.mxu2 %v3301_v33 }
 0x1db   : > { %v847_v39 = vsel %vm4071_vm5, %v827_v38, 0  ;;  %v1366_v28 = vsel %vm4071_vm5, %v1343_v21, 0 }
 0x1dd   : > { %2141 = vmatpush.bf16.msra.mxu0 %v3290_v49 }
 0x1e1   : > { %2142 = vmatpush.bf16.msra.mxu0 %v3289_v59 }
 0x1e5   : > { %971 = vmatmul.bf16.gmra.mxu2 %v3213_v40  ;;  %v3280_v40 = vld [vmem:[#allocation9 + $0x180] sm:$0xff]  ;;  %2143 = vmatpush.bf16.msra.mxu0 %v3288_v0 }
 0x1e6   : > { %1068 = vmatmul.bf16.gmra.mxu3 %v811_v2  ;;  %2005 = vmatpush.bf16.msra.mxu1 %v3280_v40 }
 0x1e7   : > { %1182 = vmatmul.bf16.gmra.mxu1 %v846_v6  ;;  %v813_v6 = vsel %vm4066_vm4, 0, %v794_v1 }
 0x1e8   : > { %1472 = vmatmul.bf16.gmra.mxu0 %v1339_v11  ;;  %v4183_v11 = vld [vmem:[#allocation2 + $0x10] sm:$0xff] }
 0x1e9   : > { %v1830_v17 = vshrl.u32 %v4183_v11, 16 }
 0x1ea   : > { %3370 = vmatpush.bf16.msrb.mxu1 %v4141_v53  ;;  %v1320_v53 = vshrl.u32 %v4171_v54, 16 }
 0x1eb   : > { %v1832_v19 = vrot.slane %v1830_v17, 7 }
 0x1ec   : > { %v1322_v2 = vrot.slane %v1320_v53, 7 }
 0x1ee   : > { %3371 = vmatpush.bf16.msrb.mxu1 %v3294_v10  ;;  %v1325_v8 = vor.u32 %v1323_v3, %v1322_v2  ;;  %v3300_v2 = vld [vmem:[#allocation9 + $0x220] sm:$0xff] }
 0x1ef   : > { %3381 = vmatpush.bf16.msra.mxu2 %v3300_v2 }
 0x1f0   : > { %v1341_v12 = vsel %vm4066_vm4, 0, %v1325_v8 }
 0x1f2   : > { %3372 = vmatpush.bf16.msrb.mxu1 %v3293_v20  ;;  %v1833_v20 = vshll.u32 %v4183_v11, 16 }
 0x1f4   : > { %v1835_v25 = vor.u32 %v1833_v20, %v1832_v19 }
 0x1f5   : > { %976 = vmatmul.bf16.gmra.mxu2 %v3214_v5  ;;  %v829_v5 = vor.u32 %v828_v62, %v789_v51 }
 0x1f6   : > { %1073 = vmatmul.bf16.gmra.mxu3 %v812_v44  ;;  %3373 = vmatpush.bf16.msrb.mxu1 %v3292_v31  ;;  %v1893_v22 = vsel %vm4066_vm4, 0, %v1835_v25  ;;  %v4201_v31 = vld [vmem:[#allocation2 + $0x18] sm:$0xff] }
 0x1f7   : > { %1187 = vmatmul.bf16.gmra.mxu1 %v847_v39  ;;  %v848_v10 = vsel %vm4071_vm5, %v829_v5, 0  ;;  %v1837_v14 = vshrl.u32 %v4201_v31, 16 }
 0x1f8   : > { %1477 = vmatmul.bf16.gmra.mxu0 %v1340_v50 }
 0x1fa   : > { %3374 = vmatpush.bf16.msrb.mxu1 %v3291_v42  ;;  %v1344_v42 = vrot.slane %v1281_v45, 1 }
 0x1fe   : > { %3375 = vmatpush.bf16.msrb.mxu1 %v3290_v49  ;;  %v1345_v49 = vor.u32 %v1344_v42, %v1278_v41  ;;  %v4243_v42 = vld [vmem:[#allocation2 + $0x28] sm:$0xff] }
 0x200   : > { %v1367_v58 = vsel %vm4071_vm5, %v1345_v49, 0 }
 0x202   : > { %3376 = vmatpush.bf16.msrb.mxu1 %v3289_v59 }
 0x205   : > { %981 = vmatmul.bf16.gmra.mxu2 %v3215_v47  ;;  %v1840_v47 = vshll.u32 %v4201_v31, 16 }
 0x206   : > { %1078 = vmatmul.bf16.gmra.mxu3 %v813_v6  ;;  %3377 = vmatpush.bf16.msrb.mxu1 %v3288_v0  ;;  %v4221_v0 = vld [vmem:[#allocation2 + $0x20] sm:$0xff] }
 0x207   : > { %1192 = vmatmul.bf16.gmra.mxu1 %v848_v10  ;;  %v1844_v5 = vshrl.u32 %v4221_v0, 16  ;;  %v1847_v19 = vshll.u32 %v4221_v0, 16 }
 0x208   : > { %1482 = vmatmul.bf16.gmra.mxu0 %v1341_v12  ;;  %v1346_v12 = vrot.slane %v1288_v60, 1 }
 0x214   : > { %v1158_v29 = vpop.f32.mrf.mxu1 }
 0x215   : > { %1585 = vmatmul.bf16.vlgmr.msrb.gmra.mxu2 %v4059_v7  ;;  %v1448_v32 = vpop.f32.mrf.mxu0  ;;  %v1839_v7 = vrot.slane %v1837_v14, 7 }
 0x216   : > { %1715 = vmatmul.bf16.vlgmr.msrb.gmra.mxu3 %v1366_v28  ;;  %v1347_v28 = vor.u32 %v1346_v12, %v1285_v56 }
 0x217   : > { %2006 = vmatmul.bf16.vlgmr.msra.gmra.mxu1 %v1893_v22  ;;  %v1842_v50 = vor.u32 %v1840_v47, %v1839_v7  ;;  %v1851_v7 = vshrl.u32 %v4243_v42, 16 }
 0x218   : > { %2266 = vmatpush.bf16.msra.mxu1 %v3303_v57  ;;  %v947_v35 = vpop.f32.mrf.mxu2  ;;  %2144 = vmatmul.bf16.vlgmr.msra.gmra.mxu0 %v4183_v11  ;;  %v1368_v60 = vsel %vm4071_vm5, %v1347_v28, 0 }
 0x219   : > { %v1044_v38 = vpop.f32.mrf.mxu3  ;;  %v1894_v62 = vsel %vm4066_vm4, 0, %v1842_v50 }
 0x21a   : > { %v1045_v40 = vadd.f32 %v1044_v38, %v947_v35 }
 0x21c   : > { %v1160_v44 = vpop.f32.mrf.mxu1  ;;  %v1198_v46 = vadd.f32 %v1158_v29, %v1045_v40  ;;  %2267 = vmatpush.bf16.msra.mxu1 %v3302_v16 }
 0x21d   : > { %v1450_v48 = vpop.f32.mrf.mxu0 }
 0x21e   : > { %v4211_v39 = vadd.f32 %v1448_v32, %v1198_v46  ;;  %v3299_v46 = vld [vmem:[#allocation9 + $0x218] sm:$0xff] }
 0x21f   : > { %3382 = vmatpush.bf16.msra.mxu2 %v3299_v46 }
 0x220   : > { %2268 = vmatpush.bf16.msra.mxu1 %v3301_v33  ;;  %v949_v51 = vpop.f32.mrf.mxu2 }
 0x221   : > { %v1046_v45 = vpop.f32.mrf.mxu3 }
 0x222   : > { %v1047_v57 = vadd.f32 %v1046_v45, %v949_v51  ;;  %v1348_v51 = vrot.slane %v1295_v13, 1 }
 0x224   : > { %v1163_v59 = vpop.f32.mrf.mxu1  ;;  %v1199_v61 = vadd.f32 %v1160_v44, %v1047_v57  ;;  %2269 = vmatpush.bf16.msra.mxu1 %v3300_v2 }
 0x225   : > { %1590 = vmatmul.bf16.gmra.mxu2 %v4083_v36  ;;  %v1453_v41 = vpop.f32.mrf.mxu0  ;;  %v1846_v36 = vrot.slane %v1844_v5, 7 }
 0x226   : > { %v4223_v1 = vadd.f32 %v1450_v48, %v1199_v61  ;;  %1720 = vmatmul.bf16.gmra.mxu3 %v1367_v58  ;;  %v1854_v58 = vshll.u32 %v4243_v42, 16 }
 0x227   : > { %2011 = vmatmul.bf16.gmra.mxu1 %v1894_v62  ;;  %v1849_v29 = vor.u32 %v1847_v19, %v1846_v36  ;;  %v1349_v62 = vor.u32 %v1348_v51, %v1292_v9 }
 0x228   : > { %v952_v6 = vpop.f32.mrf.mxu2  ;;  %2149 = vmatmul.bf16.gmra.mxu0 %v4201_v31  ;;  %2270 = vmatpush.bf16.msra.mxu1 %v3299_v46 }
 0x229   : > { %v1049_v8 = vpop.f32.mrf.mxu3  ;;  %v1895_v40 = vsel %vm4066_vm4, 0, %v1849_v29  ;;  %v1369_v13 = vsel %vm4071_vm5, %v1349_v62, 0 }
 0x22a   : > { %v1050_v10 = vadd.f32 %v1049_v8, %v952_v6 }
 0x22c   : > { %v1165_v16 = vpop.f32.mrf.mxu1  ;;  %v1200_v18 = vadd.f32 %v1163_v59, %v1050_v10 }
 0x22d   : > { %v1455_v25 = vpop.f32.mrf.mxu0 }
 0x22e   : > { %v4233_v21 = vadd.f32 %v1453_v41, %v1200_v18  ;;  %v4265_v18 = vld [vmem:[#allocation2 + $0x30] sm:$0xff] }
 0x22f   : > { %v1858_v28 = vshrl.u32 %v4265_v18, 16 }
 0x230   : > { %v954_v22 = vpop.f32.mrf.mxu2 }
 0x231   : > { %v1051_v32 = vpop.f32.mrf.mxu3 }
 0x232   : > { %v1052_v33 = vadd.f32 %v1051_v32, %v954_v22 }
 0x234   : > { %v1168_v35 = vpop.f32.mrf.mxu1  ;;  %v1201_v38 = vadd.f32 %v1165_v16, %v1052_v33  ;;  %v1350_v33 = vrot.slane %v1302_v34, 1 }
 0x235   : > { %1595 = vmatmul.bf16.gmra.mxu2 %v4097_v52  ;;  %v1458_v56 = vpop.f32.mrf.mxu0  ;;  %v1853_v52 = vrot.slane %v1851_v7, 7 }
 0x236   : > { %v4245_v44 = vadd.f32 %v1455_v25, %v1201_v38  ;;  %1725 = vmatmul.bf16.gmra.mxu3 %v1368_v60  ;;  %v3298_v25 = vld [vmem:[#allocation9 + $0x210] sm:$0xff]  ;;  %v1861_v38 = vshll.u32 %v4265_v18, 16  ;;  %v1351_v46 = vor.u32 %v1350_v33, %v1299_v30 }
 0x237   : > { %2016 = vmatmul.bf16.gmra.mxu1 %v1895_v40  ;;  %v1856_v41 = vor.u32 %v1854_v58, %v1853_v52  ;;  %3383 = vmatpush.bf16.msra.mxu2 %v3298_v25 }
 0x238   : > { %v957_v48 = vpop.f32.mrf.mxu2  ;;  %2154 = vmatmul.bf16.gmra.mxu0 %v4221_v0  ;;  %2271 = vmatpush.bf16.msra.mxu1 %v3298_v25  ;;  %v1370_v34 = vsel %vm4071_vm5, %v1351_v46, 0 }
 0x239   : > { %v1054_v49 = vpop.f32.mrf.mxu3  ;;  %v1896_v16 = vsel %vm4066_vm4, 0, %v1856_v41  ;;  %v3297_v41 = vld [vmem:[#allocation9 + $0x208] sm:$0xff] }
 0x23a   : > { %v1055_v50 = vadd.f32 %v1054_v49, %v957_v48 }
 0x23b   : > { %3384 = vmatpush.bf16.msra.mxu2 %v3297_v41 }
 0x23c   : > { %v1170_v45 = vpop.f32.mrf.mxu1  ;;  %v1202_v57 = vadd.f32 %v1168_v35, %v1055_v50  ;;  %2272 = vmatpush.bf16.msra.mxu1 %v3297_v41 }
 0x23d   : > { %v1460_v61 = vpop.f32.mrf.mxu0 }
 0x23e   : > { %v4255_v59 = vadd.f32 %v1458_v56, %v1202_v57 }
 0x240   : > { %v959_v2 = vpop.f32.mrf.mxu2 }
 0x241   : > { %v1056_v6 = vpop.f32.mrf.mxu3 }
 0x242   : > { %v1057_v8 = vadd.f32 %v1056_v6, %v959_v2 }
 0x244   : > { %v1173_v10 = vpop.f32.mrf.mxu1  ;;  %v1203_v12 = vadd.f32 %v1170_v45, %v1057_v8 }
 0x245   : > { %1600 = vmatmul.bf16.gmra.mxu2 %v4111_v4  ;;  %v1463_v9 = vpop.f32.mrf.mxu0  ;;  %v1860_v4 = vrot.slane %v1858_v28, 7 }
 0x246   : > { %v4267_v36 = vadd.f32 %v1460_v61, %v1203_v12  ;;  %1730 = vmatmul.bf16.gmra.mxu3 %v1369_v13  ;;  %v4287_v61 = vld [vmem:[#allocation2 + $0x38] sm:$0xff] }
 0x247   : > { %2021 = vmatmul.bf16.gmra.mxu1 %v1896_v16  ;;  %v1863_v48 = vor.u32 %v1861_v38, %v1860_v4  ;;  %v1865_v2 = vshrl.u32 %v4287_v61, 16 }
 0x248   : > { %v962_v29 = vpop.f32.mrf.mxu2  ;;  %2159 = vmatmul.bf16.gmra.mxu0 %v4243_v42  ;;  %v1909_v42 = vrot.slane %v1861_v38, 1 }
 0x249   : > { %v1059_v22 = vpop.f32.mrf.mxu3  ;;  %v1897_v52 = vsel %vm4066_vm4, 0, %v1863_v48  ;;  %v4309_v48 = vld [vmem:[#allocation2 + $0x40] sm:$0xff] }
 0x24a   : > { %v1060_v32 = vadd.f32 %v1059_v22, %v962_v29 }
 0x24c   : > { %v1175_v60 = vpop.f32.mrf.mxu1  ;;  %v1204_v35 = vadd.f32 %v1173_v10, %v1060_v32  ;;  %v1352_v10 = vrot.slane %v1309_v63, 1 }
 0x24d   : > { %v1465_v56 = vpop.f32.mrf.mxu0 }
 0x24e   : > { %v4277_v40 = vadd.f32 %v1463_v9, %v1204_v35  ;;  %v1868_v9 = vshll.u32 %v4287_v61, 16  ;;  %v1353_v22 = vor.u32 %v1352_v10, %v1306_v55 }
 0x250   : > { %v964_v49 = vpop.f32.mrf.mxu2  ;;  %v1371_v63 = vsel %vm4071_vm5, %v1353_v22, 0 }
 0x251   : > { %v1061_v50 = vpop.f32.mrf.mxu3 }
 0x252   : > { %v1062_v51 = vadd.f32 %v1061_v50, %v964_v49  ;;  %v3296_v50 = vld [vmem:[#allocation9 + $0x200] sm:$0xff] }
 0x253   : > { %3385 = vmatpush.bf16.msra.mxu2 %v3296_v50  ;;  %2273 = vmatpush.bf16.msra.mxu1 %v3296_v50 }
 0x254   : > { %v1178_v45 = vpop.f32.mrf.mxu1  ;;  %v1205_v57 = vadd.f32 %v1175_v60, %v1062_v51  ;;  %v1872_v51 = vshrl.u32 %v4309_v48, 16 }
 0x255   : > { %1605 = vmatmul.bf16.gmra.mxu2 %v4125_v23  ;;  %v1468_v30 = vpop.f32.mrf.mxu0  ;;  %v1867_v23 = vrot.slane %v1865_v2, 7 }
 0x256   : > { %v4289_v62 = vadd.f32 %v1465_v56, %v1205_v57  ;;  %1735 = vmatmul.bf16.gmra.mxu3 %v1370_v34 }
 0x257   : > { %2026 = vmatmul.bf16.gmra.mxu1 %v1897_v52  ;;  %v1870_v32 = vor.u32 %v1868_v9, %v1867_v23  ;;  %v1354_v52 = vrot.slane %v1316_v37, 1 }
 0x258   : > { %v967_v6 = vpop.f32.mrf.mxu2  ;;  %2164 = vmatmul.bf16.gmra.mxu0 %v4265_v18  ;;  %v1911_v18 = vrot.slane %v1868_v9, 1 }
 0x259   : > { %v1064_v8 = vpop.f32.mrf.mxu3  ;;  %v1898_v46 = vsel %vm4066_vm4, 0, %v1870_v32  ;;  %v1355_v10 = vor.u32 %v1354_v52, %v1313_v26 }
 0x25a   : > { %v1065_v13 = vadd.f32 %v1064_v8, %v967_v6  ;;  %v1875_v6 = vshll.u32 %v4309_v48, 16 }
 0x25b   : > { %v1372_v37 = vsel %vm4071_vm5, %v1355_v10, 0 }
 0x25c   : > { %v1180_v12 = vpop.f32.mrf.mxu1  ;;  %v1206_v16 = vadd.f32 %v1178_v45, %v1065_v13 }
 0x25d   : > { %v1470_v29 = vpop.f32.mrf.mxu0 }
 0x25e   : > { %v4299_v25 = vadd.f32 %v1468_v30, %v1206_v16 }
 0x260   : > { %v969_v33 = vpop.f32.mrf.mxu2 }
 0x261   : > { %v1066_v60 = vpop.f32.mrf.mxu3 }
 0x262   : > { %v1067_v35 = vadd.f32 %v1066_v60, %v969_v33  ;;  %v4331_v60 = vld [vmem:[#allocation2 + $0x48] sm:$0xff] }
 0x264   : > { %v1183_v4 = vpop.f32.mrf.mxu1  ;;  %v1207_v56 = vadd.f32 %v1180_v12, %v1067_v35 }
 0x265   : > { %1610 = vmatmul.bf16.gmra.mxu2 %v4137_v43  ;;  %v1473_v55 = vpop.f32.mrf.mxu0  ;;  %v1874_v43 = vrot.slane %v1872_v51, 7 }
 0x266   : > { %v4311_v49 = vadd.f32 %v1470_v29, %v1207_v56  ;;  %1740 = vmatmul.bf16.gmra.mxu3 %v1371_v63  ;;  %v1879_v63 = vshrl.u32 %v4331_v60, 16 }
 0x267   : > { %2031 = vmatmul.bf16.gmra.mxu1 %v1898_v46  ;;  %v1877_v12 = vor.u32 %v1875_v6, %v1874_v43 }
 0x268   : > { %v972_v34 = vpop.f32.mrf.mxu2  ;;  %2169 = vmatmul.bf16.gmra.mxu0 %v4287_v61  ;;  %v1913_v61 = vrot.slane %v1875_v6, 1 }
 0x269   : > { %v1069_v45 = vpop.f32.mrf.mxu3  ;;  %v1899_v33 = vsel %vm4066_vm4, 0, %v1877_v12 }
 0x26a   : > { %v1070_v57 = vadd.f32 %v1069_v45, %v972_v34  ;;  %v1881_v45 = vrot.slane %v1879_v63, 7 }
 0x26c   : > { %v1185_v30 = vpop.f32.mrf.mxu1  ;;  %v1208_v41 = vadd.f32 %v1183_v4, %v1070_v57 }
 0x26d   : > { %v1475_v13 = vpop.f32.mrf.mxu0 }
 0x26e   : > { %v4321_v8 = vadd.f32 %v1473_v55, %v1208_v41  ;;  %v1356_v55 = vrot.slane %v1323_v3, 1 }
 0x270   : > { %v974_v16 = vpop.f32.mrf.mxu2 }
 0x271   : > { %v1071_v23 = vpop.f32.mrf.mxu3 }
 0x272   : > { %v1072_v29 = vadd.f32 %v1071_v23, %v974_v16 }
 0x274   : > { %v1188_v22 = vpop.f32.mrf.mxu1  ;;  %v1209_v32 = vadd.f32 %v1185_v30, %v1072_v29  ;;  %v1357_v30 = vor.u32 %v1356_v55, %v1320_v53 }
 0x275   : > { %1615 = vmatmul.bf16.gmra.mxu2 %v4156_v15  ;;  %v1478_v26 = vpop.f32.mrf.mxu0  ;;  %v1882_v15 = vshll.u32 %v4331_v60, 16 }
 0x276   : > { %v4333_v35 = vadd.f32 %v1475_v13, %v1209_v32  ;;  %1745 = vmatmul.bf16.gmra.mxu3 %v1372_v37  ;;  %v1373_v3 = vsel %vm4071_vm5, %v1357_v30, 0 }
 0x277   : > { %2036 = vmatmul.bf16.gmra.mxu1 %v1899_v33  ;;  %v1884_v41 = vor.u32 %v1882_v15, %v1881_v45  ;;  %v3311_v33 = vld [vmem:[#allocation11 + $0x38] sm:$0xff] }
 0x278   : > { %v977_v4 = vpop.f32.mrf.mxu2  ;;  %2174 = vmatmul.bf16.gmra.mxu0 %v4309_v48  ;;  %3386 = vmatpush.bf16.msra.mxu3 %v3311_v33  ;;  %v3305_v48 = vld [vmem:[#allocation11 + $0x8] sm:$0xff] }
 0x279   : > { %v1074_v56 = vpop.f32.mrf.mxu3  ;;  %v1900_v23 = vsel %vm4066_vm4, 0, %v1884_v41 }
 0x27a   : > { %v1075_v46 = vadd.f32 %v1074_v56, %v977_v4 }
 0x27c   : > { %v1190_v50 = vpop.f32.mrf.mxu1  ;;  %v1210_v34 = vadd.f32 %v1188_v22, %v1075_v46 }
 0x27d   : > { %v1480_v52 = vpop.f32.mrf.mxu0 }
 0x27e   : > { %v4343_v57 = vadd.f32 %v1478_v26, %v1210_v34  ;;  %v1903_v26 = vrot.slane %v1840_v47, 1 }
 0x280   : > { %v979_v43 = vpop.f32.mrf.mxu2  ;;  %v1904_v24 = vor.u32 %v1903_v26, %v1837_v14  ;;  %v3310_v14 = vld [vmem:[#allocation11 + $0x30] sm:$0xff] }
 0x281   : > { %v1076_v13 = vpop.f32.mrf.mxu3  ;;  %3387 = vmatpush.bf16.msra.mxu3 %v3310_v14 }
 0x282   : > { %v1077_v10 = vadd.f32 %v1076_v13, %v979_v43  ;;  %v1926_v45 = vsel %vm4071_vm5, %v1904_v24, 0  ;;  %v1905_v13 = vrot.slane %v1847_v19, 1 }
 0x284   : > { %v1193_v12 = vpop.f32.mrf.mxu1  ;;  %v1211_v16 = vadd.f32 %v1190_v50, %v1077_v10  ;;  %v1901_v10 = vrot.slane %v1833_v20, 1 }
 0x285   : > { %1620 = vmatmul.bf16.gmra.mxu2 %v4171_v54  ;;  %v1483_v53 = vpop.f32.mrf.mxu0 }
 0x286   : > { %v4353_v29 = vadd.f32 %v1480_v52, %v1211_v16  ;;  %1750 = vmatmul.bf16.gmra.mxu3 %v1373_v3 }
 0x287   : > { %2041 = vmatmul.bf16.gmra.mxu1 %v1900_v23  ;;  %v1906_v23 = vor.u32 %v1905_v13, %v1844_v5  ;;  %v1910_v13 = vor.u32 %v1909_v42, %v1858_v28 }
 0x288   : > { %v982_v37 = vpop.f32.mrf.mxu2 }
 0x289   : > { %v1079_v22 = vpop.f32.mrf.mxu3  ;;  %v1927_v19 = vsel %vm4071_vm5, %v1906_v23, 0 }
 0x28a   : > { %v1080_v32 = vadd.f32 %v1079_v22, %v982_v37 }
 0x28c   : > { %v1195_v4 = vpop.f32.mrf.mxu1  ;;  %v1212_v56 = vadd.f32 %v1193_v12, %v1080_v32 }
 0x28d   : > { %v1485_v34 = vpop.f32.mrf.mxu0 }
 0x28e   : > { %v4358_v46 = vadd.f32 %v1483_v53, %v1212_v56  ;;  %v1902_v53 = vor.u32 %v1901_v10, %v1830_v17  ;;  %v3309_v17 = vld [vmem:[#allocation11 + $0x28] sm:$0xff] }
 0x28f   : > { %3388 = vmatpush.bf16.msra.mxu3 %v3309_v17 }
 0x290   : > { %v984_v55 = vpop.f32.mrf.mxu2 }
 0x291   : > { %v1081_v54 = vpop.f32.mrf.mxu3 }
 0x292   : > { %v1082_v50 = vadd.f32 %v1081_v54, %v984_v55 }
 0x294   : > { %v2007_v52 = vpop.f32.mrf.mxu1  ;;  %v1213_v30 = vadd.f32 %v1195_v4, %v1082_v50 }
 0x295   : > { %2279 = vmatmul.bf16.vlgmr.msra.gmra.mxu2 %v1926_v45 }
 0x296   : > { %v4364_v41 = vadd.f32 %v1485_v34, %v1213_v30 }
 0x297   : > { %2179 = vmatmul.bf16.vlgmr.msrb.gmra.mxu1 %v4331_v60 }
 0x298   : > { %2443 = vmatpush.bf16.msrb.mxu1 %v3311_v33  ;;  %v1586_v47 = vpop.f32.mrf.mxu2  ;;  %v1925_v33 = vsel %vm4071_vm5, %v1902_v53, 0 }
 0x299   : > { %v1716_v43 = vpop.f32.mrf.mxu3  ;;  %v1626_v31 = vadd.f32 %v1586_v47, %v4211_v39 }
 0x29b   : > { %v1756_v3 = vadd.f32 %v1716_v43, %v1626_v31  ;;  %v3308_v31 = vld [vmem:[#allocation11 + $0x20] sm:$0xff] }
 0x29c   : > { %v2009_v12 = vpop.f32.mrf.mxu1  ;;  %2444 = vmatpush.bf16.msrb.mxu1 %v3310_v14  ;;  %3389 = vmatpush.bf16.msra.mxu3 %v3308_v31 }
 0x29d   : > { %v4372_v16 = vadd.f32 %v2007_v52, %v1756_v3 }
 0x2a0   : > { %v1588_v39 = vpop.f32.mrf.mxu2  ;;  %2445 = vmatpush.bf16.msrb.mxu1 %v3309_v17 }
 0x2a1   : > { %v1718_v37 = vpop.f32.mrf.mxu3  ;;  %v1627_v22 = vadd.f32 %v1588_v39, %v4223_v1  ;;  %v1907_v1 = vrot.slane %v1854_v58, 1 }
 0x2a3   : > { %v1757_v20 = vadd.f32 %v1718_v37, %v1627_v22  ;;  %v1908_v55 = vor.u32 %v1907_v1, %v1851_v7 }
 0x2a4   : > { %v2012_v32 = vpop.f32.mrf.mxu1  ;;  %2446 = vmatpush.bf16.msrb.mxu1 %v3308_v31  ;;  %v4433_v31 = vpop.f32.mrf.mxu0 }
 0x2a5   : > { %2284 = vmatmul.bf16.gmra.mxu2 %v1927_v19  ;;  %v4383_v26 = vadd.f32 %v2009_v12, %v1757_v20  ;;  %v3307_v19 = vld [vmem:[#allocation11 + $0x18] sm:$0xff] }
 0x2a6   : > { %3390 = vmatpush.bf16.msra.mxu3 %v3307_v19 }
 0x2a7   : > { %2274 = vmatmul.bf16.vlgmr.msra.gmra.mxu1 %v1925_v33 }
 0x2a8   : > { %v1591_v0 = vpop.f32.mrf.mxu2  ;;  %2447 = vmatpush.bf16.msrb.mxu1 %v3307_v19 }
 0x2a9   : > { %v1721_v5 = vpop.f32.mrf.mxu3  ;;  %v1628_v11 = vadd.f32 %v1591_v0, %v4233_v21  ;;  %v1928_v21 = vsel %vm4071_vm5, %v1908_v55, 0  ;;  %v3306_v55 = vld [vmem:[#allocation11 + $0x10] sm:$0xff] }
 0x2aa   : > { %3391 = vmatpush.bf16.msra.mxu3 %v3306_v55 }
 0x2ab   : > { %v1758_v4 = vadd.f32 %v1721_v5, %v1628_v11 }
 0x2ac   : > { %v2014_v56 = vpop.f32.mrf.mxu1  ;;  %2448 = vmatpush.bf16.msrb.mxu1 %v3306_v55 }
 0x2ad   : > { %v4388_v24 = vadd.f32 %v2012_v32, %v1758_v4  ;;  %v1912_v32 = vor.u32 %v1911_v18, %v1865_v2 }
 0x2ae   : > { %3392 = vmatpush.bf16.msra.mxu3 %v3305_v48 }
 0x2b0   : > { %v1593_v54 = vpop.f32.mrf.mxu2  ;;  %2449 = vmatpush.bf16.msrb.mxu1 %v3305_v48 }
 0x2b1   : > { %v1723_v50 = vpop.f32.mrf.mxu3  ;;  %v1629_v34 = vadd.f32 %v1593_v54, %v4245_v44 }
 0x2b3   : > { %v1759_v45 = vadd.f32 %v1723_v50, %v1629_v34  ;;  %v1914_v50 = vor.u32 %v1913_v61, %v1872_v51  ;;  %v1915_v51 = vrot.slane %v1882_v15, 1 }
 0x2b4   : > { %v2017_v52 = vpop.f32.mrf.mxu1 }
 0x2b5   : > { %2289 = vmatmul.bf16.gmra.mxu2 %v1928_v21  ;;  %v4395_v58 = vadd.f32 %v2014_v56, %v1759_v45 }
 0x2b8   : > { %v1596_v30 = vpop.f32.mrf.mxu2 }
 0x2b9   : > { %v1726_v47 = vpop.f32.mrf.mxu3  ;;  %v1630_v43 = vadd.f32 %v1596_v30, %v4255_v59  ;;  %v1929_v59 = vsel %vm4071_vm5, %v1910_v13, 0  ;;  %v1916_v13 = vor.u32 %v1915_v51, %v1879_v63 }
 0x2bb   : > { %v1760_v7 = vadd.f32 %v1726_v47, %v1630_v43 }
 0x2bc   : > { %v2019_v14 = vpop.f32.mrf.mxu1 }
 0x2bd   : > { %v4400_v44 = vadd.f32 %v2017_v52, %v1760_v7 }
 0x2c0   : > { %v1598_v10 = vpop.f32.mrf.mxu2 }
 0x2c1   : > { %v1728_v3 = vpop.f32.mrf.mxu3  ;;  %v1631_v12 = vadd.f32 %v1598_v10, %v4267_v36 }
 0x2c3   : > { %v1761_v23 = vadd.f32 %v1728_v3, %v1631_v12 }
 0x2c4   : > { %v2022_v53 = vpop.f32.mrf.mxu1 }
 0x2c5   : > { %2294 = vmatmul.bf16.gmra.mxu2 %v1929_v59  ;;  %v4407_v38 = vadd.f32 %v2019_v14, %v1761_v23  ;;  %v2147_v59 = vpop.f32.mrf.mxu0 }
 0x2c8   : > { %v1601_v39 = vpop.f32.mrf.mxu2 }
 0x2c9   : > { %v1731_v37 = vpop.f32.mrf.mxu3  ;;  %v1632_v22 = vadd.f32 %v1601_v39, %v4277_v40  ;;  %v1930_v40 = vsel %vm4071_vm5, %v1912_v32, 0 }
 0x2cb   : > { %v1762_v28 = vadd.f32 %v1731_v37, %v1632_v22 }
 0x2cc   : > { %v2024_v20 = vpop.f32.mrf.mxu1 }
 0x2cd   : > { %v4412_v36 = vadd.f32 %v2022_v53, %v1762_v28  ;;  %v2150_v63 = vpop.f32.mrf.mxu0  ;;  %v3304_v28 = vld [vmem:[#allocation11] sm:$0xff] }
 0x2ce   : > { %3393 = vmatpush.bf16.msra.mxu3 %v3304_v28  ;;  %2450 = vmatpush.bf16.msrb.mxu1 %v3304_v28 }
 0x2d0   : > { %v1603_v33 = vpop.f32.mrf.mxu2 }
 0x2d1   : > { %v1733_v0 = vpop.f32.mrf.mxu3  ;;  %v1633_v5 = vadd.f32 %v1603_v33, %v4289_v62 }
 0x2d3   : > { %v1763_v11 = vadd.f32 %v1733_v0, %v1633_v5 }
 0x2d4   : > { %v2027_v17 = vpop.f32.mrf.mxu1 }
 0x2d5   : > { %2299 = vmatmul.bf16.gmra.mxu2 %v1930_v40  ;;  %v4419_v9 = vadd.f32 %v2024_v20, %v1763_v11  ;;  %v2152_v5 = vpop.f32.mrf.mxu0 }
 0x2d8   : > { %v1606_v1 = vpop.f32.mrf.mxu2 }
 0x2d9   : > { %v1736_v4 = vpop.f32.mrf.mxu3  ;;  %v1634_v56 = vadd.f32 %v1606_v1, %v4299_v25  ;;  %v1931_v25 = vsel %vm4071_vm5, %v1914_v50, 0 }
 0x2db   : > { %v1764_v2 = vadd.f32 %v1736_v4, %v1634_v56 }
 0x2dc   : > { %v2029_v54 = vpop.f32.mrf.mxu1 }
 0x2dd   : > { %v4424_v62 = vadd.f32 %v2027_v17, %v1764_v2  ;;  %v2155_v2 = vpop.f32.mrf.mxu0 }
 0x2e0   : > { %v1608_v34 = vpop.f32.mrf.mxu2 }
 0x2e1   : > { %v1738_v21 = vpop.f32.mrf.mxu3  ;;  %v1635_v45 = vadd.f32 %v1608_v34, %v4311_v49 }
 0x2e3   : > { %v1765_v52 = vadd.f32 %v1738_v21, %v1635_v45  ;;  %v2187_v45 = vadd.f32 %v2150_v63, %v4388_v24 }
 0x2e4   : > { %v2032_v30 = vpop.f32.mrf.mxu1 }
 0x2e5   : > { %2304 = vmatmul.bf16.gmra.mxu2 %v1931_v25  ;;  %v4431_v6 = vadd.f32 %v2029_v54, %v1765_v52  ;;  %v2157_v52 = vpop.f32.mrf.mxu0 }
 0x2e8   : > { %v1611_v47 = vpop.f32.mrf.mxu2 }
 0x2e9   : > { %v1741_v43 = vpop.f32.mrf.mxu3  ;;  %v1636_v42 = vadd.f32 %v1611_v47, %v4321_v8  ;;  %v1932_v8 = vsel %vm4071_vm5, %v1916_v13, 0  ;;  %v4463_v47 = vld [vmem:[%s4640_s25] ss:$0 sm:$0xff]  ;;  %v2185_v13 = vadd.f32 %v4433_v31, %v4372_v16 }
 0x2eb   : > { %v1766_v7 = vadd.f32 %v1741_v43, %v1636_v42 }
 0x2ec   : > { %v2034_v49 = vpop.f32.mrf.mxu1 }
 0x2ed   : > { %v4438_v14 = vadd.f32 %v2032_v30, %v1766_v7 }
 0x2f0   : > { %v1613_v10 = vpop.f32.mrf.mxu2 }
 0x2f1   : > { %v1743_v3 = vpop.f32.mrf.mxu3  ;;  %v1637_v12 = vadd.f32 %v1613_v10, %v4333_v35  ;;  %v2160_v10 = vpop.f32.mrf.mxu0 }
 0x2f3   : > { %v1767_v23 = vadd.f32 %v1743_v3, %v1637_v12 }
 0x2f4   : > { %v2037_v53 = vpop.f32.mrf.mxu1 }
 0x2f5   : > { %2309 = vmatmul.bf16.gmra.mxu2 %v1932_v8  ;;  %v4445_v15 = vadd.f32 %v2034_v49, %v1767_v23  ;;  %v2186_v23 = vadd.f32 %v2147_v59, %v4383_v26 }
 0x2f8   : > { %v1616_v39 = vpop.f32.mrf.mxu2 }
 0x2f9   : > { %v1746_v37 = vpop.f32.mrf.mxu3  ;;  %v1638_v22 = vadd.f32 %v1616_v39, %v4343_v57  ;;  %v2162_v63 = vpop.f32.mrf.mxu0 }
 0x2fb   : > { %v1768_v19 = vadd.f32 %v1746_v37, %v1638_v22 }
 0x2fc   : > { %v2039_v60 = vpop.f32.mrf.mxu1 }
 0x2fd   : > { %v4448_v18 = vadd.f32 %v2037_v53, %v1768_v19 }
 0x300   : > { %v1618_v27 = vpop.f32.mrf.mxu2 }
 0x301   : > { %v1748_v35 = vpop.f32.mrf.mxu3  ;;  %v1639_v20 = vadd.f32 %v1618_v27, %v4353_v29 }
 0x303   : > { %v1769_v32 = vadd.f32 %v1748_v35, %v1639_v20 }
 0x304   : > { %v2042_v33 = vpop.f32.mrf.mxu1 }
 0x305   : > { %v4451_v0 = vadd.f32 %v2039_v60, %v1769_v32  ;;  %v2190_v60 = vadd.f32 %v2157_v52, %v4407_v38 }
 0x308   : > { %v1621_v40 = vpop.f32.mrf.mxu2 }
 0x309   : > { %v1751_v11 = vpop.f32.mrf.mxu3  ;;  %v1640_v57 = vadd.f32 %v1621_v40, %v4358_v46  ;;  %v2191_v40 = vadd.f32 %v2160_v10, %v4412_v36 }
 0x30b   : > { %v1770_v17 = vadd.f32 %v1751_v11, %v1640_v57  ;;  %v2192_v11 = vadd.f32 %v2162_v63, %v4419_v9 }
 0x30c   : > { %v2044_v1 = vpop.f32.mrf.mxu1 }
 0x30d   : > { %v2061_v4 = vadd.f32 %v2042_v33, %v1770_v17 }
 0x310   : > { %v1623_v56 = vpop.f32.mrf.mxu2 }
 0x311   : > { %v1753_v55 = vpop.f32.mrf.mxu3  ;;  %v1641_v61 = vadd.f32 %v1623_v56, %v4364_v41  ;;  %v2188_v41 = vadd.f32 %v2152_v5, %v4395_v58  ;;  %v2189_v58 = vadd.f32 %v2155_v2, %v4400_v44  ;;  %v2165_v5 = vpop.f32.mrf.mxu0 }
 0x313   : > { %v1771_v54 = vadd.f32 %v1753_v55, %v1641_v61 }
 0x314   : > { %v2180_v50 = vpop.f32.mrf.mxu1 }
 0x315   : > { %v4455_v29 = vadd.f32 %v2180_v50, %v2061_v4  ;;  %v2062_v34 = vadd.f32 %v2044_v1, %v1771_v54  ;;  %v2193_v50 = vadd.f32 %v2165_v5, %v4424_v62 }
 0x318   : > { %v2280_v21 = vpop.f32.mrf.mxu2 }
 0x319   : > { %v2317_v46 = vadd.f32 %v2280_v21, %v2187_v45  ;;  %v2167_v56 = vpop.f32.mrf.mxu0 }
 0x31a   : > { %v2194_v36 = vadd.f32 %v2167_v56, %v4431_v6 }
 0x31b   : > { %v2337_v42 = vadd.f32 %v4463_v47, %v2317_v46 }
 0x31c   : > { %v2182_v25 = vpop.f32.mrf.mxu1 }
 0x31d   : > { %v4458_v30 = vadd.f32 %v2182_v25, %v2062_v34  ;;  %v2353_v24 = vmax.f32 %v2337_v42, 0.0 }
 0x320   : > { %v2282_v43 = vpop.f32.mrf.mxu2 }
 0x321   : > { %v2318_v48 = vadd.f32 %v2282_v43, %v2188_v41  ;;  %v2170_v21 = vpop.f32.mrf.mxu0 }
 0x323   : > { %v2338_v51 = vadd.f32 %v4463_v47, %v2318_v48 }
 0x324   : > { %v2275_v7 = vpop.f32.mrf.mxu1 }
 0x325   : > { %v2354_v49 = vmax.f32 %v2338_v51, 0.0  ;;  %v2315_v12 = vadd.f32 %v2275_v7, %v2185_v13  ;;  %v2195_v51 = vadd.f32 %v2170_v21, %v4438_v14  ;;  %v2496_v21 = vld [vmem:[%s3986_s5 + $0x20] sm:$0xff] }
 0x327   : > { %v2368_v3 = vpack.c.bf16 %v2354_v49, %v2353_v24  ;;  %v2335_v39 = vadd.f32 %v4463_v47, %v2315_v12 }
 0x328   : > { %v2285_v8 = vpop.f32.mrf.mxu2 }
 0x329   : > { %2456 = vmatmul.bf16.vlgmr.msra.gmra.mxu3 %v2368_v3  ;;  %v2319_v22 = vadd.f32 %v2285_v8, %v2189_v58  ;;  %v2351_v16 = vmax.f32 %v2335_v39, 0.0  ;;  %v2172_v42 = vpop.f32.mrf.mxu0 }
 0x32a   : > { %v2196_v62 = vadd.f32 %v2172_v42, %v4445_v15 }
 0x32b   : > { %v2339_v27 = vadd.f32 %v4463_v47, %v2319_v22 }
 0x32c   : > { %v2277_v53 = vpop.f32.mrf.mxu1 }
 0x32d   : > { %v2316_v37 = vadd.f32 %v2277_v53, %v2186_v23  ;;  %v2355_v44 = vmax.f32 %v2339_v27, 0.0 }
 0x32f   : > { %v2336_v19 = vadd.f32 %v4463_v47, %v2316_v37 }
 0x330   : > { %v2287_v28 = vpop.f32.mrf.mxu2 }
 0x331   : > { %v2352_v31 = vmax.f32 %v2336_v19, 0.0  ;;  %v2320_v35 = vadd.f32 %v2287_v28, %v2190_v60  ;;  %v2175_v13 = vpop.f32.mrf.mxu0 }
 0x332   : > { %v2197_v58 = vadd.f32 %v2175_v13, %v4448_v18 }
 0x333   : > { %v2367_v20 = vpack.c.bf16 %v2352_v31, %v2351_v16  ;;  %v2340_v26 = vadd.f32 %v4463_v47, %v2320_v35 }
 0x335   : > { %2451 = vmatmul.bf16.vlgmr.msrb.gmra.mxu1 %v2367_v20  ;;  %v2356_v59 = vmax.f32 %v2340_v26, 0.0 }
 0x337   : > { %v2369_v32 = vpack.c.bf16 %v2356_v59, %v2355_v44  ;;  %v4500_v59 = vld [vmem:[%s4641_s4] ss:$0 sm:$0xff] }
 0x338   : > { %v2290_v33 = vpop.f32.mrf.mxu2 }
 0x339   : > { %2461 = vmatmul.bf16.gmra.mxu3 %v2369_v32  ;;  %v2321_v38 = vadd.f32 %v2290_v33, %v2191_v40  ;;  %v2177_v53 = vpop.f32.mrf.mxu0  ;;  %v2494_v32 = vld [vmem:[%s3986_s5 + $0x10] sm:$0xff]  ;;  %v2492_v40 = vld [vmem:[%s3986_s5] sm:$0xff] }
 0x33a   : > { %v2198_v14 = vadd.f32 %v2177_v53, %v4451_v0 }
 0x33b   : > { %v2341_v17 = vadd.f32 %v4463_v47, %v2321_v38 }
 0x33d   : > { %v2357_v55 = vmax.f32 %v2341_v17, 0.0  ;;  %v2495_v17 = vld [vmem:[%s3986_s5 + $0x18] sm:$0xff] }
 0x340   : > { %v2292_v57 = vpop.f32.mrf.mxu2 }
 0x341   : > { %v2322_v1 = vadd.f32 %v2292_v57, %v2192_v11 }
 0x343   : > { %v2342_v4 = vadd.f32 %v4463_v47, %v2322_v1 }
 0x345   : > { %v2358_v61 = vmax.f32 %v2342_v4, 0.0 }
 0x347   : > { %v2370_v2 = vpack.c.bf16 %v2358_v61, %v2357_v55 }
 0x348   : > { %v2295_v54 = vpop.f32.mrf.mxu2 }
 0x349   : > { %2466 = vmatmul.bf16.gmra.mxu3 %v2370_v2  ;;  %v2323_v34 = vadd.f32 %v2295_v54, %v2193_v50  ;;  %v2493_v2 = vld [vmem:[%s3986_s5 + $0x8] sm:$0xff] }
 0x34b   : > { %v2343_v9 = vadd.f32 %v4463_v47, %v2323_v34 }
 0x34d   : > { %v2359_v46 = vmax.f32 %v2343_v9, 0.0 }
 0x350   : > { %v2297_v45 = vpop.f32.mrf.mxu2 }
 0x351   : > { %v2324_v25 = vadd.f32 %v2297_v45, %v2194_v36 }
 0x353   : > { %v2344_v52 = vadd.f32 %v4463_v47, %v2324_v25 }
 0x355   : > { %v2360_v41 = vmax.f32 %v2344_v52, 0.0 }
 0x357   : > { %v2371_v43 = vpack.c.bf16 %v2360_v41, %v2359_v46  ;;  %v2497_v46 = vld [vmem:[%s3986_s5 + $0x28] sm:$0xff] }
 0x358   : > { %v2300_v48 = vpop.f32.mrf.mxu2 }
 0x359   : > { %2471 = vmatmul.bf16.gmra.mxu3 %v2371_v43  ;;  %v2325_v7 = vadd.f32 %v2300_v48, %v2195_v51  ;;  %v2498_v51 = vld [vmem:[%s3986_s5 + $0x30] sm:$0xff] }
 0x35b   : > { %v2345_v6 = vadd.f32 %v4463_v47, %v2325_v7 }
 0x35d   : > { %v2361_v3 = vmax.f32 %v2345_v6, 0.0 }
 0x360   : > { %v2302_v24 = vpop.f32.mrf.mxu2 }
 0x361   : > { %v2326_v49 = vadd.f32 %v2302_v24, %v2196_v62 }
 0x363   : > { %v2346_v10 = vadd.f32 %v4463_v47, %v2326_v49  ;;  %v2499_v49 = vld [vmem:[%s3986_s5 + $0x38] sm:$0xff] }
 0x365   : > { %v2362_v12 = vmax.f32 %v2346_v10, 0.0 }
 0x367   : > { %v2372_v8 = vpack.c.bf16 %v2362_v12, %v2361_v3 }
 0x368   : > { %v2305_v23 = vpop.f32.mrf.mxu2 }
 0x369   : > { %2476 = vmatmul.bf16.gmra.mxu3 %v2372_v8  ;;  %v2327_v39 = vadd.f32 %v2305_v23, %v2197_v58  ;;  %v2500_v8 = vld [vmem:[%s3986_s5 + $0x40] sm:$0xff] }
 0x36b   : > { %v2347_v15 = vadd.f32 %v4463_v47, %v2327_v39 }
 0x36d   : > { %v2363_v60 = vmax.f32 %v2347_v15, 0.0 }
 0x370   : > { %v2307_v37 = vpop.f32.mrf.mxu2 }
 0x371   : > { %v2328_v22 = vadd.f32 %v2307_v37, %v2198_v14  ;;  %v2501_v14 = vld [vmem:[%s3986_s5 + $0x48] sm:$0xff] }
 0x373   : > { %v2348_v19 = vadd.f32 %v4463_v47, %v2328_v22 }
 0x375   : > { %v2364_v63 = vmax.f32 %v2348_v19, 0.0 }
 0x377   : > { %v2373_v16 = vpack.c.bf16 %v2364_v63, %v2363_v60  ;;  %v2502_v60 = vld [vmem:[%s3986_s5 + $0x50] sm:$0xff] }
 0x378   : > { %v2310_v31 = vpop.f32.mrf.mxu2 }
 0x379   : > { %2481 = vmatmul.bf16.gmra.mxu3 %v2373_v16  ;;  %v2329_v28 = vadd.f32 %v2310_v31, %v4455_v29 }
 0x37b   : > { %v2349_v27 = vadd.f32 %v4463_v47, %v2329_v28 }
 0x37d   : > { %v2365_v20 = vmax.f32 %v2349_v27, 0.0 }
 0x380   : > { %v2312_v18 = vpop.f32.mrf.mxu2 }
 0x381   : > { %v2330_v0 = vadd.f32 %v2312_v18, %v4458_v30  ;;  %v2503_v18 = vld [vmem:[%s3986_s5 + $0x58] sm:$0xff] }
 0x383   : > { %v2350_v35 = vadd.f32 %v4463_v47, %v2330_v0 }
 0x385   : > { %v2366_v26 = vmax.f32 %v2350_v35, 0.0 }
 0x387   : > { %v2374_v44 = vpack.c.bf16 %v2366_v26, %v2365_v20  ;;  %v2504_v26 = vld [vmem:[%s3986_s5 + $0x60] sm:$0xff] }
 0x389   : > { %2486 = vmatmul.bf16.gmra.mxu3 %v2374_v44 }
 0x3ac   : > { %v2457_v29 = vpop.f32.mrf.mxu3 }
 0x3ad   : > { %v2458_v33 = vadd.f32 %v4500_v59, %v2457_v29 }
 0x3af   : > { %v2510_v5 = vadd.f32 %v2494_v32, %v2458_v33 }
 0x3b1   : > { %v2526_v30 = vmax.f32 %v2510_v5, 0.0  ;;  %v2505_v5 = vld [vmem:[%s3986_s5 + $0x68] sm:$0xff] }
 0x3b2   : > { %v2452_v47 = vpop.f32.mrf.mxu1 }
 0x3b3   : > { %v2453_v38 = vadd.f32 %v4500_v59, %v2452_v47  ;;  %2542 = vst [vmem:[%s4055_s2 + $0x10] sm:$0xff] %v2526_v30 }
 0x3b4   : > { %v2459_v57 = vpop.f32.mrf.mxu3 }
 0x3b5   : > { %v2508_v11 = vadd.f32 %v2492_v40, %v2453_v38  ;;  %v2460_v1 = vadd.f32 %v4500_v59, %v2459_v57 }
 0x3b7   : > { %v2524_v4 = vmax.f32 %v2508_v11, 0.0  ;;  %v2511_v56 = vadd.f32 %v2495_v17, %v2460_v1  ;;  %v2506_v11 = vld [vmem:[%s3986_s5 + $0x70] sm:$0xff] }
 0x3b9   : > { %2540 = vst [vmem:[%s4055_s2] sm:$0xff] %v2524_v4  ;;  %v2527_v55 = vmax.f32 %v2511_v56, 0.0  ;;  %v2507_v56 = vld [vmem:[%s3986_s5 + $0x78] sm:$0xff]  ;;  %s3689_s5 = scalar_lea.hbm %s4643_s19, 512 }
 0x3ba   : > { %v2454_v61 = vpop.f32.mrf.mxu1  ;;  %p3691_p13 = scmp.lt.s32.totalorder %s3689_s5, %s3685_s15 }
 0x3bb   : > { %v2455_v54 = vadd.f32 %v4500_v59, %v2454_v61  ;;  %2543 = vst [vmem:[%s4055_s2 + $0x18] sm:$0xff] %v2527_v55 }
 0x3bc   : > { %v2462_v34 = vpop.f32.mrf.mxu3  ;;  %p3692_p0 = por %p3691_p13, %p3690_p12 }
 0x3bd   : > { %v2509_v50 = vadd.f32 %v2493_v2, %v2455_v54  ;;  %v2463_v36 = vadd.f32 %v4500_v59, %v2462_v34 }
 0x3be   : > { %p3693_p5 = pnand %p3692_p0, %p3688_p11 }
 0x3bf   : > { %v2525_v45 = vmax.f32 %v2509_v50, 0.0  ;;  %v2512_v9 = vadd.f32 %v2496_v21, %v2463_v36 }
 0x3c1   : > { %2541 = vst [vmem:[%s4055_s2 + $0x8] sm:$0xff] %v2525_v45  ;;  %v2528_v25 = vmax.f32 %v2512_v9, 0.0 }
 0x3c3   : > { %2544 = vst [vmem:[%s4055_s2 + $0x20] sm:$0xff] %v2528_v25 }
 0x3c4   : > { %v2464_v52 = vpop.f32.mrf.mxu3 }
 0x3c5   : > { %v2465_v41 = vadd.f32 %v4500_v59, %v2464_v52 }
 0x3c7   : > { %v2513_v43 = vadd.f32 %v2497_v46, %v2465_v41 }
 0x3c9   : > { %v2529_v42 = vmax.f32 %v2513_v43, 0.0 }
 0x3cb   : > { %2545 = vst [vmem:[%s4055_s2 + $0x28] sm:$0xff] %v2529_v42 }
 0x3cc   : > { %v2467_v48 = vpop.f32.mrf.mxu3 }
 0x3cd   : > { %v2468_v7 = vadd.f32 %v4500_v59, %v2467_v48 }
 0x3cf   : > { %v2514_v62 = vadd.f32 %v2498_v51, %v2468_v7 }
 0x3d1   : > { %v2530_v24 = vmax.f32 %v2514_v62, 0.0 }
 0x3d3   : > { %2546 = vst [vmem:[%s4055_s2 + $0x30] sm:$0xff] %v2530_v24 }
 0x3d4   : > { %v2469_v6 = vpop.f32.mrf.mxu3 }
 0x3d5   : > { %v2470_v13 = vadd.f32 %v4500_v59, %v2469_v6 }
 0x3d7   : > { %v2515_v10 = vadd.f32 %v2499_v49, %v2470_v13 }
 0x3d9   : > { %v2531_v3 = vmax.f32 %v2515_v10, 0.0 }
 0x3db   : > { %2547 = vst [vmem:[%s4055_s2 + $0x38] sm:$0xff] %v2531_v3 }
 0x3dc   : > { %v2472_v12 = vpop.f32.mrf.mxu3 }
 0x3dd   : > { %v2473_v23 = vadd.f32 %v4500_v59, %v2472_v12 }
 0x3df   : > { %v2516_v58 = vadd.f32 %v2500_v8, %v2473_v23 }
 0x3e1   : > { %v2532_v53 = vmax.f32 %v2516_v58, 0.0 }
 0x3e3   : > { %2548 = vst [vmem:[%s4055_s2 + $0x40] sm:$0xff] %v2532_v53 }
 0x3e4   : > { %v2474_v39 = vpop.f32.mrf.mxu3 }
 0x3e5   : > { %v2475_v37 = vadd.f32 %v4500_v59, %v2474_v39 }
 0x3e7   : > { %v2517_v15 = vadd.f32 %v2501_v14, %v2475_v37 }
 0x3e9   : > { %v2533_v22 = vmax.f32 %v2517_v15, 0.0 }
 0x3eb   : > { %2549 = vst [vmem:[%s4055_s2 + $0x48] sm:$0xff] %v2533_v22 }
 0x3ec   : > { %v2477_v19 = vpop.f32.mrf.mxu3 }
 0x3ed   : > { %v2478_v63 = vadd.f32 %v4500_v59, %v2477_v19 }
 0x3ef   : > { %v2518_v16 = vadd.f32 %v2502_v60, %v2478_v63 }
 0x3f1   : > { %v2534_v31 = vmax.f32 %v2518_v16, 0.0 }
 0x3f3   : > { %2550 = vst [vmem:[%s4055_s2 + $0x50] sm:$0xff] %v2534_v31 }
 0x3f4   : > { %v2479_v28 = vpop.f32.mrf.mxu3 }
 0x3f5   : > { %v2480_v27 = vadd.f32 %v4500_v59, %v2479_v28 }
 0x3f7   : > { %v2519_v0 = vadd.f32 %v2503_v18, %v2480_v27 }
 0x3f9   : > { %v2535_v35 = vmax.f32 %v2519_v0, 0.0 }
 0x3fb   : > { %2551 = vst [vmem:[%s4055_s2 + $0x58] sm:$0xff] %v2535_v35 }
 0x3fc   : > { %v2482_v20 = vpop.f32.mrf.mxu3 }
 0x3fd   : > { %v2483_v44 = vadd.f32 %v4500_v59, %v2482_v20 }
 0x3ff   : > { %v2520_v29 = vadd.f32 %v2504_v26, %v2483_v44 }
 0x401   : > { %v2536_v32 = vmax.f32 %v2520_v29, 0.0 }
 0x403   : > { %2552 = vst [vmem:[%s4055_s2 + $0x60] sm:$0xff] %v2536_v32 }
 0x404   : > { %v2484_v33 = vpop.f32.mrf.mxu3 }
 0x405   : > { %v2485_v30 = vadd.f32 %v4500_v59, %v2484_v33 }
 0x407   : > { %v2521_v47 = vadd.f32 %v2505_v5, %v2485_v30 }
 0x409   : > { %v2537_v40 = vmax.f32 %v2521_v47, 0.0 }
 0x40b   : > { %2553 = vst [vmem:[%s4055_s2 + $0x68] sm:$0xff] %v2537_v40 }
 0x40c   : > { %v2487_v38 = vpop.f32.mrf.mxu3 }
 0x40d   : > { %v2488_v57 = vadd.f32 %v4500_v59, %v2487_v38 }
 0x40f   : > { %v2522_v17 = vadd.f32 %v2506_v11, %v2488_v57 }
 0x411   : > { %v2538_v1 = vmax.f32 %v2522_v17, 0.0 }
 0x413   : > { %2554 = vst [vmem:[%s4055_s2 + $0x70] sm:$0xff] %v2538_v1 }
 0x414   : > { %v2489_v4 = vpop.f32.mrf.mxu3 }
 0x415   : > { %v2490_v55 = vadd.f32 %v4500_v59, %v2489_v4 }
 0x417   : > { %v2523_v61 = vadd.f32 %v2507_v56, %v2490_v55 }
 0x419   : > { %v2539_v2 = vmax.f32 %v2523_v61, 0.0 }
 0x41b   : > { %2555 = vst [vmem:[%s4055_s2 + $0x78] sm:$0xff] %v2539_v2 }
 0x41c   : > { %3696 = shalt.err (!%p3693_p5)
}
 0x41d   : > { %s3790_s6 = smov 128   ;;  %s3791_s2 = smov 8  }
 0x41e   : > { %3410 = dma.vmem_to_hbm [thread:$0]  (%p3937_p3), %s2573_s30, 2048, %s2575_s9, %s2557_s20, %s3790_s6, %s3790_s6, %s3791_s2  }
 0x41f PF: > { %s4645_s27 = sld [smem:[#allocation18_spill]]  ;;  %p3440_p7 = scmp.ge.s32.totalorder %s3779_s12, 2 }
 0x421   : > { %p3430_p9 = pnand %p3440_p7, %p3892_p6 }
 0x423   : > { %p3431_p2 = pneg %p3430_p9 }
 0x425   : > { %s2589_s14 = sand.u32 1, %s4645_s27  }
 0x426   : > { %s2590_s24 = scalar_lea.sflag [#allocation5], %s2589_s14 }
 0x427   : > { %3746 = dma.done.wait (%p3431_p2), %s2590_s24, 2048  }
 0x428   : > { %3748 = vsyncadd (%p3431_p2), %s2590_s24, 4294965248  ;;  %s28_s12 = sadd.s32 1, %s3779_s12   ;;  %s4647_s22 = sld [smem:[#allocation19_spill]] }
 0x429   : > { %p25_p1 = scmp.ge.s32.totalorder %s28_s12, 6   ;;  %s4648_s29 = sld [smem:[#allocation25_spill]] }
 0x42a   : > { %s4649_s23 = sld [smem:[#allocation22_spill]]  ;;  %s4651_s27 = smov %s3755_s28 }
 0x42b   : > { %s4650_s17 = sld [smem:[#allocation24_spill]]  ;;  %s4653_s30 = smov %s3771_s10 }
 0x42c   : > { %s4654_s9 = smov %s3775_s11 }
 0x42d   :  { %27 = sbr.rel (!%p25_p1) target bundleno = 17 (0x11), region = 141 }
 0x42e   : > { %s4652_s28 = smov %s4647_s22 }
 0x430   : > { %s4655_s10 = smov %s4649_s23 }
 0x431   : > { %s4656_s11 = smov %s4650_s17 }
 0x432   :  { %2596 = vsyncpa [#allocation4], 1 }
 0x433   :  { %2598 = vsyncpa [#allocation4 + $0x1], 1 }
 0x434   :  { %2599 = vsyncpa [#allocation7], 1 }
 0x435   :  { %2601 = vsyncpa [#allocation7 + $0x1], 1 }
 0x436   :  { %2602 = vsyncpa [#allocation10], 1 }
 0x437   :  { %2603 = vsyncpa [#allocation5], 1 }
 0x438   :  { %2605 = vsyncpa [#allocation5 + $0x1], 1 }

</bundles_post_ra>
